<compile_context>
chip_gen: v7x
topology: tpu7x:2x2x1
jax: 0.10.0
libtpu: 0.0.40
codegen_flags: <defaults>
</compile_context>

<pallas_src>
import functools

import numpy as np
import jax
import jax.numpy as jnp
from jax.experimental import pallas as pl
from jax.experimental.pallas import tpu as pltpu

_VMEM_SPEC = pl.BlockSpec(memory_space=pltpu.MemorySpace.VMEM)
_VMEM_LIMIT = 48 * 1024 * 1024        # explicit scoped-VMEM budget (v7x-safe)
_LANE = 128                           # lane width; pad Cout up to this

# parity/tap -> kernel-index table for stride-2, pad-1, k=4 transposed conv:
#   out[2a + par] = sum_d  x_pad[a + par + d] * W[..., _KSEL[par][d]]
_KSEL = ((3, 1), (2, 0))


# ------------------------------ Pallas kernels ------------------------------

def _initial_kernel(z_ref, w_ref, b_ref, o_ref):
    """ConvTranspose2d(k, C, 4, 1, 0) on a 1x1 input == (N,k)x(k,16*C) GEMM.
    BN scale pre-folded into w; fused bias + ReLU.  Output columns are ordered
    (kh, kw, co) so a reshape gives NHWC directly (no glue transpose)."""
    y = jnp.dot(z_ref[...], w_ref[...], preferred_element_type=jnp.float32)
    o_ref[...] = jnp.maximum(y + b_ref[...], 0.0)


def _pyramid_kernel(x_ref, w_ref, b_ref, o_ref, acc_ref, *, act, n_k):
    """One (row-tile x cout-tile) block of a per-parity sub-pixel ConvT layer:
    tiled matmul over the (4*Cin) contraction, f32 VMEM accumulator, fused
    bias (BN already folded into w) + ReLU / Tanh on the last k step.

    x_ref: (TR, TK) bf16   w_ref: (TK, TC) bf16   b_ref: (1, TC) f32
    o_ref: (TR, TC) f32    acc_ref: (TR, TC) f32 scratch
    """
    @pl.when(pl.program_id(3) == 0)
    def _init():
        acc_ref[...] = jnp.zeros_like(acc_ref)

    acc_ref[...] += jnp.dot(x_ref[...], w_ref[...],
                            preferred_element_type=jnp.float32)

    @pl.when(pl.program_id(3) == n_k - 1)
    def _finalize():
        y = acc_ref[...] + b_ref[...]
        if act == "relu":
            y = jnp.maximum(y, 0.0)
        else:
            y = jnp.tanh(y)
        o_ref[...] = y.astype(o_ref.dtype)


# ------------------------------ kernel wrappers ------------------------------

def _pick_tile(n, cap):
    """Largest tile <= cap dividing n (n itself if n <= cap)."""
    if n <= cap:
        return n
    t = cap
    while n % t:
        t //= 2
    return t


def _run_initial(z, w, b):
    n, m = z.shape[0], w.shape[1]
    return pl.pallas_call(
        _initial_kernel,
        out_shape=jax.ShapeDtypeStruct((n, m), jnp.float32),
        in_specs=[_VMEM_SPEC] * 3,
        out_specs=_VMEM_SPEC,
        compiler_params=pltpu.CompilerParams(vmem_limit_bytes=_VMEM_LIMIT),
    )(z, w, b)


def _run_parity_matmul(patches, wq, bias, *, act):
    """patches: (4, R, 4*Cin) bf16, wq: (4, 4*Cin, Cpad) bf16, bias: (1, Cpad) f32
    -> (4, R, Cpad) f32."""
    npar, rows, k4 = patches.shape
    cpad = wq.shape[-1]
    tr = _pick_tile(rows, 512)
    tc = _pick_tile(cpad, 256)
    tk = _pick_tile(k4, 512)
    n_k = k4 // tk
    grid = (npar, rows // tr, cpad // tc, n_k)
    kern = functools.partial(_pyramid_kernel, act=act, n_k=n_k)
    return pl.pallas_call(
        kern,
        out_shape=jax.ShapeDtypeStruct((npar, rows, cpad), jnp.float32),
        grid_spec=pltpu.PrefetchScalarGridSpec(
            num_scalar_prefetch=0,
            grid=grid,
            in_specs=[
                pl.BlockSpec((None, tr, tk), lambda p, r, c, k: (p, r, k)),
                pl.BlockSpec((None, tk, tc), lambda p, r, c, k: (p, k, c)),
                pl.BlockSpec((1, tc), lambda p, r, c, k: (0, c)),
            ],
            out_specs=pl.BlockSpec((None, tr, tc), lambda p, r, c, k: (p, r, c)),
            scratch_shapes=[pltpu.VMEM((tr, tc), jnp.float32)],
        ),
        compiler_params=pltpu.CompilerParams(
            dimension_semantics=("parallel", "parallel", "parallel", "arbitrary"),
            vmem_limit_bytes=_VMEM_LIMIT,
        ),
    )(patches, wq, bias)


# ----------------------------------- glue -----------------------------------

def _fuse_bn(gamma, beta, mean, var, eps=1e-5):
    scale = gamma / jnp.sqrt(var + eps)
    return scale, beta - mean * scale


def _round_up(x, m):
    return ((x + m - 1) // m) * m


def _prep_initial(p, k):
    """-> (w2d f32 (k, 16*c1) with BN scale folded, bias f32 (1, 16*c1), c1)."""
    w = p["w"]                                        # (k, c1, 4, 4)
    c1 = w.shape[1]
    s, b = _fuse_bn(p["gamma"], p["beta"], p["mean"], p["var"])
    w2d = jnp.transpose(w, (0, 2, 3, 1)).reshape(k, 16 * c1)   # cols (kh,kw,co)
    w2d = w2d * jnp.tile(s, 16)[None, :]
    bias = jnp.tile(b, 16)[None, :]
    return w2d, bias, c1


def _prep_pyramid_weight(w, scale, cout_pad, dtype):
    """PyTorch ConvT weight (Cin, Cout, 4, 4) -> per-parity slabs
    (4, 4*Cin, Cout_pad); rows ordered (tap=(dy,dx), ci); BN scale folded in;
    channels zero-padded to a lane-dense width."""
    cin, cout = w.shape[0], w.shape[1]
    slabs = []
    for py in (0, 1):
        for px in (0, 1):
            taps = [w[:, :, _KSEL[py][dy], _KSEL[px][dx]]
                    for dy in (0, 1) for dx in (0, 1)]          # each (Cin, Cout)
            slabs.append(jnp.stack(taps, 0).reshape(4 * cin, cout))
    wq = jnp.stack(slabs, 0) * scale[None, None, :]
    wq = jnp.pad(wq, ((0, 0), (0, 0), (0, cout_pad - cout)))
    return wq.astype(dtype)


def _make_parity_patches(x_nhwc, dtype):
    """(N, H, W, Cin) -> (4, N*H*W, 4*Cin): per-parity im2col of the 4 taps."""
    n, ih, iw, cin = x_nhwc.shape
    xp = jnp.pad(x_nhwc.astype(dtype), ((0, 0), (1, 1), (1, 1), (0, 0)))
    pats = []
    for py in (0, 1):
        for px in (0, 1):
            taps = [xp[:, py + dy: py + dy + ih, px + dx: px + dx + iw, :]
                    for dy in (0, 1) for dx in (0, 1)]
            pats.append(jnp.concatenate(taps, -1).reshape(n * ih * iw, 4 * cin))
    return jnp.stack(pats, 0)


def _interleave_parities(yq, n, ih, iw, cout):
    """(4, N*ih*iw, Cpad) -> NHWC (N, 2*ih, 2*iw, cout)."""
    y = yq[:, :, :cout].reshape(2, 2, n, ih, iw, cout)
    y = jnp.transpose(y, (2, 3, 0, 4, 1, 5))
    return y.reshape(n, 2 * ih, 2 * iw, cout)


def init_decoder_params(key, input_size, n_channel, k, ngf):
    assert input_size % 16 == 0, "isize has to be a multiple of 16"
    cngf, tisize = ngf // 2, 4
    while tisize != input_size:
        cngf *= 2
        tisize *= 2

    layer_specs = [(k, cngf, True)]          # (cin, cout, has_batchnorm)
    csize = 4
    while csize < input_size // 2:
        layer_specs.append((cngf, cngf // 2, True))
        cngf //= 2
        csize *= 2
    layer_specs.append((cngf, n_channel, False))

    params = []
    for cin, cout, has_bn in layer_specs:
        key, kw, kg, kb, km, kv = jax.random.split(key, 6)
        p = {"w": 0.1 * jax.random.normal(kw, (cin, cout, 4, 4), jnp.float32)}
        if has_bn:
            p["gamma"] = 0.5 + jax.random.uniform(kg, (cout,), jnp.float32)
            p["beta"] = 0.1 * jax.random.normal(kb, (cout,), jnp.float32)
            p["mean"] = 0.1 * jax.random.normal(km, (cout,), jnp.float32)
            p["var"] = 0.5 + jax.random.uniform(kv, (cout,), jnp.float32)
        params.append(p)
    return params


@jax.jit
def decoder_forward(x_nchw, params):
    """x_nchw: (N, k, 1, 1) latent -> (N, n_channel, input_size, input_size)."""
    n, k = x_nchw.shape[0], x_nchw.shape[1]

    # ---- initial ConvT(k, c1, 4, 1, 0) + BN + ReLU : 1x1 -> 4x4 (NHWC out) ----
    w2d, bias, c1 = _prep_initial(params[0], k)
    y = _run_initial(x_nchw.reshape(n, k), w2d, bias)   # (n, 16*c1)
    y = y.reshape(n, 4, 4, c1)                          # NHWC

    # ---- pyramid (BN+ReLU) / final (Tanh) stride-2 ConvT layers ----
    for p in params[1:]:
        cout = p["w"].shape[1]
        cout_pad = max(_LANE, _round_up(cout, _LANE))
        if "gamma" in p:
            s, b = _fuse_bn(p["gamma"], p["beta"], p["mean"], p["var"])
            act = "relu"
        else:
            s = jnp.ones((cout,), jnp.float32)
            b = jnp.zeros((cout,), jnp.float32)
            act = "tanh"
        wq = _prep_pyramid_weight(p["w"], s, cout_pad, jnp.bfloat16)
        bq = jnp.pad(b, (0, cout_pad - cout))[None, :].astype(jnp.float32)
        ih, iw = y.shape[1], y.shape[2]
        patches = _make_parity_patches(y, jnp.bfloat16)
        yq = _run_parity_matmul(patches, wq, bq, act=act)
        y = _interleave_parities(yq, n, ih, iw, cout)

    return jnp.transpose(y, (0, 3, 1, 2))               # NHWC -> NCHW


# --------------------------- numpy reference check ---------------------------

def _np_convT(x, w, stride, pad):
    n, cin, ih, iw = x.shape
    cout, kk = w.shape[1], w.shape[2]
    oh = (ih - 1) * stride - 2 * pad + kk
    out = np.zeros((n, cout, oh, oh), np.float32)
    for ni in range(n):
        for ci in range(cin):
            for hi in range(ih):
                for wi in range(iw):
                    v = x[ni, ci, hi, wi]
                    for kh in range(kk):
                        for kw in range(kk):
                            o_h = hi * stride - pad + kh
                            o_w = wi * stride - pad + kw
                            if 0 <= o_h < oh and 0 <= o_w < oh:
                                out[ni, :, o_h, o_w] += v * w[ci, :, kh, kw]
    return out


def _np_forward(x, params, eps=1e-5):
    out = np.asarray(x, np.float32)
    for i, p in enumerate(params):
        stride, pad = (1, 0) if i == 0 else (2, 1)
        out = _np_convT(out, np.asarray(p["w"], np.float32), stride, pad)
        if "gamma" in p:
            g, be = np.asarray(p["gamma"]), np.asarray(p["beta"])
            m, v = np.asarray(p["mean"]), np.asarray(p["var"])
            out = (out - m[None, :, None, None]) / np.sqrt(v[None, :, None, None] + eps)
            out = out * g[None, :, None, None] + be[None, :, None, None]
            out = np.maximum(out, 0.0)
        else:
            out = np.tanh(out)
    return out


# ----------------------------------- main ------------------------------------

if __name__ == "__main__":
    INPUT_SIZE, N_CHANNEL, K, NGF = 32, 3, 32, 32   # small but realistic channels
    BATCH = 2

    key = jax.random.PRNGKey(0)
    kx, kp = jax.random.split(key)
    params = init_decoder_params(kp, INPUT_SIZE, N_CHANNEL, K, NGF)
    x = jax.random.normal(kx, (BATCH, K, 1, 1), jnp.float32)

    out = decoder_forward(x, params)
    out = jax.block_until_ready(out)
    assert out.shape == (BATCH, N_CHANNEL, INPUT_SIZE, INPUT_SIZE), out.shape

    ref = _np_forward(np.asarray(x), jax.tree_util.tree_map(np.asarray, params))
    # bf16 MXU inputs -> relaxed tolerance vs the f32 reference.
    np.testing.assert_allclose(np.asarray(out), ref, rtol=3e-2, atol=3e-2)

    print("KERNEL_OK")
</pallas_src>

<mosaic_0001>
module attributes {stable_mosaic.version = 11 : i64} {
  func.func @_initial_kernel(%arg0: memref<2x32xf32, #tpu.memory_space<vmem>>, %arg1: memref<32x2048xf32, #tpu.memory_space<vmem>>, %arg2: memref<1x2048xf32, #tpu.memory_space<vmem>>, %arg3: memref<2x2048xf32, #tpu.memory_space<vmem>>) attributes {dimension_semantics = [], scalar_prefetch = 0 : i64, scratch_operands = 0 : i64, tpu.core_type = #tpu.core_type<tc>} {
    %c0 = arith.constant 0 : index
    %c0_0 = arith.constant 0 : index
    %0 = vector.load %arg0[%c0, %c0_0] : memref<2x32xf32, #tpu.memory_space<vmem>>, vector<2x32xf32>
    %c0_1 = arith.constant 0 : index
    %c0_2 = arith.constant 0 : index
    %1 = vector.load %arg1[%c0_1, %c0_2] : memref<32x2048xf32, #tpu.memory_space<vmem>>, vector<32x2048xf32>
    %cst = arith.constant dense<0.000000e+00> : vector<2x2048xf32>
    %2 = tpu.matmul %0, %1, %cst {dimension_numbers = #tpu.dot_dimension_numbers<[1], [0], [0], [1], [0, 0, 1, 1], [], []>} : vector<2x32xf32>, vector<32x2048xf32>, vector<2x2048xf32> -> vector<2x2048xf32>
    %c0_3 = arith.constant 0 : index
    %c0_4 = arith.constant 0 : index
    %3 = vector.load %arg2[%c0_3, %c0_4] : memref<1x2048xf32, #tpu.memory_space<vmem>>, vector<1x2048xf32>
    %4 = vector.broadcast %3 : vector<1x2048xf32> to vector<2x2048xf32>
    %5 = arith.addf %2, %4 : vector<2x2048xf32>
    %cst_5 = arith.constant 0.000000e+00 : f32
    %6 = vector.broadcast %cst_5 : f32 to vector<2x2048xf32>
    %7 = arith.maximumf %5, %6 : vector<2x2048xf32>
    %c0_6 = arith.constant 0 : index
    %c0_7 = arith.constant 0 : index
    %8 = vector.load %arg3[%c0_6, %c0_7] : memref<2x2048xf32, #tpu.memory_space<vmem>>, vector<2x2048xf32>
    tpu.vector_store %arg3[%c0_6, %c0_7], %7 {strides = array<i32>} : memref<2x2048xf32, #tpu.memory_space<vmem>>, vector<2x2048xf32>,
    return
  }
}

module attributes {stable_mosaic.version = 11 : i64} {
  func.func @_pyramid_kernel(%arg0: i32, %arg1: i32, %arg2: i32, %arg3: i32, %arg4: memref<1x32x512xbf16, #tpu.memory_space<vmem>>, %arg5: memref<1x512x128xbf16, #tpu.memory_space<vmem>>, %arg6: memref<1x128xf32, #tpu.memory_space<vmem>>, %arg7: memref<1x32x128xf32, #tpu.memory_space<vmem>>, %arg8: memref<32x128xf32, #tpu.memory_space<vmem>>) attributes {dimension_semantics = [#tpu.dimension_semantics<parallel>, #tpu.dimension_semantics<parallel>, #tpu.dimension_semantics<parallel>, #tpu.dimension_semantics<arbitrary>], iteration_bounds = array<i64: 4, 1, 1, 1>, scalar_prefetch = 0 : i64, scratch_operands = 1 : i64, tpu.core_type = #tpu.core_type<tc>, window_params = [{transform_indices = @transform_0, window_bounds = array<i64: 1, 32, 512>}, {transform_indices = @transform_1, window_bounds = array<i64: 1, 512, 128>}, {transform_indices = @transform_2, window_bounds = array<i64: 1, 128>}, {transform_indices = @transform_3, window_bounds = array<i64: 1, 32, 128>}]} {
    %c0_i32 = arith.constant 0 : i32
    %0 = arith.cmpi eq, %arg3, %c0_i32 : i32
    %1 = arith.extui %0 : i1 to i32
    %c0_i32_0 = arith.constant 0 : i32
    %2 = arith.cmpi ne, %1, %c0_i32_0 : i32
    scf.if %2 {
      %cst_12 = arith.constant 0.000000e+00 : f32
      %14 = vector.broadcast %cst_12 : f32 to vector<32x128xf32>
      %c0_13 = arith.constant 0 : index
      %c0_14 = arith.constant 0 : index
      %15 = vector.load %arg8[%c0_13, %c0_14] : memref<32x128xf32, #tpu.memory_space<vmem>>, vector<32x128xf32>
      tpu.vector_store %arg8[%c0_13, %c0_14], %14 {strides = array<i32>} : memref<32x128xf32, #tpu.memory_space<vmem>>, vector<32x128xf32>,
    } else {
    }
    %c0 = arith.constant 0 : index
    %c0_1 = arith.constant 0 : index
    %3 = vector.load %arg8[%c0, %c0_1] : memref<32x128xf32, #tpu.memory_space<vmem>>, vector<32x128xf32>
    %c0_2 = arith.constant 0 : index
    %c0_3 = arith.constant 0 : index
    %c0_4 = arith.constant 0 : index
    %4 = vector.load %arg4[%c0_2, %c0_3, %c0_4] : memref<1x32x512xbf16, #tpu.memory_space<vmem>>, vector<1x32x512xbf16>
    %5 = vector.shape_cast %4 : vector<1x32x512xbf16> to vector<32x512xbf16>
    %c0_5 = arith.constant 0 : index
    %c0_6 = arith.constant 0 : index
    %c0_7 = arith.constant 0 : index
    %6 = vector.load %arg5[%c0_5, %c0_6, %c0_7] : memref<1x512x128xbf16, #tpu.memory_space<vmem>>, vector<1x512x128xbf16>
    %7 = vector.shape_cast %6 : vector<1x512x128xbf16> to vector<512x128xbf16>
    %cst = arith.constant dense<0.000000e+00> : vector<32x128xf32>
    %8 = tpu.matmul %5, %7, %cst {dimension_numbers = #tpu.dot_dimension_numbers<[1], [0], [0], [1], [0, 0, 1, 1], [], []>} : vector<32x512xbf16>, vector<512x128xbf16>, vector<32x128xf32> -> vector<32x128xf32>
    %9 = arith.addf %3, %8 : vector<32x128xf32>
    %c0_8 = arith.constant 0 : index
    %c0_9 = arith.constant 0 : index
    %10 = vector.load %arg8[%c0_8, %c0_9] : memref<32x128xf32, #tpu.memory_space<vmem>>, vector<32x128xf32>
    tpu.vector_store %arg8[%c0_8, %c0_9], %9 {strides = array<i32>} : memref<32x128xf32, #tpu.memory_space<vmem>>, vector<32x128xf32>,
    %c0_i32_10 = arith.constant 0 : i32
    %11 = arith.cmpi eq, %arg3, %c0_i32_10 : i32
    %12 = arith.extui %11 : i1 to i32
    %c0_i32_11 = arith.constant 0 : i32
    %13 = arith.cmpi ne, %12, %c0_i32_11 : i32
    scf.if %13 {
      %c0_12 = arith.constant 0 : index
      %c0_13 = arith.constant 0 : index
      %14 = vector.load %arg8[%c0_12, %c0_13] : memref<32x128xf32, #tpu.memory_space<vmem>>, vector<32x128xf32>
      %c0_14 = arith.constant 0 : index
      %c0_15 = arith.constant 0 : index
      %15 = vector.load %arg6[%c0_14, %c0_15] : memref<1x128xf32, #tpu.memory_space<vmem>>, vector<1x128xf32>
      %16 = vector.broadcast %15 : vector<1x128xf32> to vector<32x128xf32>
      %17 = arith.addf %14, %16 : vector<32x128xf32>
      %cst_16 = arith.constant 0.000000e+00 : f32
      %18 = vector.broadcast %cst_16 : f32 to vector<32x128xf32>
      %19 = arith.maximumf %17, %18 : vector<32x128xf32>
      %c0_17 = arith.constant 0 : index
      %c0_18 = arith.constant 0 : index
      %c0_19 = arith.constant 0 : index
      %20 = vector.load %arg7[%c0_17, %c0_18, %c0_19] : memref<1x32x128xf32, #tpu.memory_space<vmem>>, vector<1x32x128xf32>
      %21 = vector.shape_cast %20 : vector<1x32x128xf32> to vector<32x128xf32>
      %22 = vector.shape_cast %19 : vector<32x128xf32> to vector<1x32x128xf32>
      tpu.vector_store %arg7[%c0_17, %c0_18, %c0_19], %22 {strides = array<i32>} : memref<1x32x128xf32, #tpu.memory_space<vmem>>, vector<1x32x128xf32>,
    } else {
    }
    return
  }
  func.func @transform_0(%arg0: i32, %arg1: i32, %arg2: i32, %arg3: i32) -> (i32, i32, i32) {
    %c0_i32 = arith.constant 0 : i32
    return %arg0, %arg1, %arg3 : i32, i32, i32
  }
  func.func @transform_1(%arg0: i32, %arg1: i32, %arg2: i32, %arg3: i32) -> (i32, i32, i32) {
    %c0_i32 = arith.constant 0 : i32
    return %arg0, %arg3, %arg2 : i32, i32, i32
  }
  func.func @transform_2(%arg0: i32, %arg1: i32, %arg2: i32, %arg3: i32) -> (i32, i32) {
    %c0_i32 = arith.constant 0 : i32
    %c0_i32_0 = arith.constant 0 : i32
    return %c0_i32, %arg2 : i32, i32
  }
  func.func @transform_3(%arg0: i32, %arg1: i32, %arg2: i32, %arg3: i32) -> (i32, i32, i32) {
    %c0_i32 = arith.constant 0 : i32
    return %arg0, %arg1, %arg2 : i32, i32, i32
  }
}

module attributes {stable_mosaic.version = 11 : i64} {
  func.func @_pyramid_kernel(%arg0: i32, %arg1: i32, %arg2: i32, %arg3: i32, %arg4: memref<1x128x256xbf16, #tpu.memory_space<vmem>>, %arg5: memref<1x256x128xbf16, #tpu.memory_space<vmem>>, %arg6: memref<1x128xf32, #tpu.memory_space<vmem>>, %arg7: memref<1x128x128xf32, #tpu.memory_space<vmem>>, %arg8: memref<128x128xf32, #tpu.memory_space<vmem>>) attributes {dimension_semantics = [#tpu.dimension_semantics<parallel>, #tpu.dimension_semantics<parallel>, #tpu.dimension_semantics<parallel>, #tpu.dimension_semantics<arbitrary>], iteration_bounds = array<i64: 4, 1, 1, 1>, scalar_prefetch = 0 : i64, scratch_operands = 1 : i64, tpu.core_type = #tpu.core_type<tc>, window_params = [{transform_indices = @transform_0, window_bounds = array<i64: 1, 128, 256>}, {transform_indices = @transform_1, window_bounds = array<i64: 1, 256, 128>}, {transform_indices = @transform_2, window_bounds = array<i64: 1, 128>}, {transform_indices = @transform_3, window_bounds = array<i64: 1, 128, 128>}]} {
    %c0_i32 = arith.constant 0 : i32
    %0 = arith.cmpi eq, %arg3, %c0_i32 : i32
    %1 = arith.extui %0 : i1 to i32
    %c0_i32_0 = arith.constant 0 : i32
    %2 = arith.cmpi ne, %1, %c0_i32_0 : i32
    scf.if %2 {
      %cst_12 = arith.constant 0.000000e+00 : f32
      %14 = vector.broadcast %cst_12 : f32 to vector<128x128xf32>
      %c0_13 = arith.constant 0 : index
      %c0_14 = arith.constant 0 : index
      %15 = vector.load %arg8[%c0_13, %c0_14] : memref<128x128xf32, #tpu.memory_space<vmem>>, vector<128x128xf32>
      tpu.vector_store %arg8[%c0_13, %c0_14], %14 {strides = array<i32>} : memref<128x128xf32, #tpu.memory_space<vmem>>, vector<128x128xf32>,
    } else {
    }
    %c0 = arith.constant 0 : index
    %c0_1 = arith.constant 0 : index
    %3 = vector.load %arg8[%c0, %c0_1] : memref<128x128xf32, #tpu.memory_space<vmem>>, vector<128x128xf32>
    %c0_2 = arith.constant 0 : index
    %c0_3 = arith.constant 0 : index
    %c0_4 = arith.constant 0 : index
    %4 = vector.load %arg4[%c0_2, %c0_3, %c0_4] : memref<1x128x256xbf16, #tpu.memory_space<vmem>>, vector<1x128x256xbf16>
    %5 = vector.shape_cast %4 : vector<1x128x256xbf16> to vector<128x256xbf16>
    %c0_5 = arith.constant 0 : index
    %c0_6 = arith.constant 0 : index
    %c0_7 = arith.constant 0 : index
    %6 = vector.load %arg5[%c0_5, %c0_6, %c0_7] : memref<1x256x128xbf16, #tpu.memory_space<vmem>>, vector<1x256x128xbf16>
    %7 = vector.shape_cast %6 : vector<1x256x128xbf16> to vector<256x128xbf16>
    %cst = arith.constant dense<0.000000e+00> : vector<128x128xf32>
    %8 = tpu.matmul %5, %7, %cst {dimension_numbers = #tpu.dot_dimension_numbers<[1], [0], [0], [1], [0, 0, 1, 1], [], []>} : vector<128x256xbf16>, vector<256x128xbf16>, vector<128x128xf32> -> vector<128x128xf32>
    %9 = arith.addf %3, %8 : vector<128x128xf32>
    %c0_8 = arith.constant 0 : index
    %c0_9 = arith.constant 0 : index
    %10 = vector.load %arg8[%c0_8, %c0_9] : memref<128x128xf32, #tpu.memory_space<vmem>>, vector<128x128xf32>
    tpu.vector_store %arg8[%c0_8, %c0_9], %9 {strides = array<i32>} : memref<128x128xf32, #tpu.memory_space<vmem>>, vector<128x128xf32>,
    %c0_i32_10 = arith.constant 0 : i32
    %11 = arith.cmpi eq, %arg3, %c0_i32_10 : i32
    %12 = arith.extui %11 : i1 to i32
    %c0_i32_11 = arith.constant 0 : i32
    %13 = arith.cmpi ne, %12, %c0_i32_11 : i32
    scf.if %13 {
      %c0_12 = arith.constant 0 : index
      %c0_13 = arith.constant 0 : index
      %14 = vector.load %arg8[%c0_12, %c0_13] : memref<128x128xf32, #tpu.memory_space<vmem>>, vector<128x128xf32>
      %c0_14 = arith.constant 0 : index
      %c0_15 = arith.constant 0 : index
      %15 = vector.load %arg6[%c0_14, %c0_15] : memref<1x128xf32, #tpu.memory_space<vmem>>, vector<1x128xf32>
      %16 = vector.broadcast %15 : vector<1x128xf32> to vector<128x128xf32>
      %17 = arith.addf %14, %16 : vector<128x128xf32>
      %cst_16 = arith.constant 0.000000e+00 : f32
      %18 = vector.broadcast %cst_16 : f32 to vector<128x128xf32>
      %19 = arith.maximumf %17, %18 : vector<128x128xf32>
      %c0_17 = arith.constant 0 : index
      %c0_18 = arith.constant 0 : index
      %c0_19 = arith.constant 0 : index
      %20 = vector.load %arg7[%c0_17, %c0_18, %c0_19] : memref<1x128x128xf32, #tpu.memory_space<vmem>>, vector<1x128x128xf32>
      %21 = vector.shape_cast %20 : vector<1x128x128xf32> to vector<128x128xf32>
      %22 = vector.shape_cast %19 : vector<128x128xf32> to vector<1x128x128xf32>
      tpu.vector_store %arg7[%c0_17, %c0_18, %c0_19], %22 {strides = array<i32>} : memref<1x128x128xf32, #tpu.memory_space<vmem>>, vector<1x128x128xf32>,
    } else {
    }
    return
  }
  func.func @transform_0(%arg0: i32, %arg1: i32, %arg2: i32, %arg3: i32) -> (i32, i32, i32) {
    %c0_i32 = arith.constant 0 : i32
    return %arg0, %arg1, %arg3 : i32, i32, i32
  }
  func.func @transform_1(%arg0: i32, %arg1: i32, %arg2: i32, %arg3: i32) -> (i32, i32, i32) {
    %c0_i32 = arith.constant 0 : i32
    return %arg0, %arg3, %arg2 : i32, i32, i32
  }
  func.func @transform_2(%arg0: i32, %arg1: i32, %arg2: i32, %arg3: i32) -> (i32, i32) {
    %c0_i32 = arith.constant 0 : i32
    %c0_i32_0 = arith.constant 0 : i32
    return %c0_i32, %arg2 : i32, i32
  }
  func.func @transform_3(%arg0: i32, %arg1: i32, %arg2: i32, %arg3: i32) -> (i32, i32, i32) {
    %c0_i32 = arith.constant 0 : i32
    return %arg0, %arg1, %arg2 : i32, i32, i32
  }
}

module attributes {stable_mosaic.version = 11 : i64} {
  func.func @_pyramid_kernel(%arg0: i32, %arg1: i32, %arg2: i32, %arg3: i32, %arg4: memref<1x512x128xbf16, #tpu.memory_space<vmem>>, %arg5: memref<1x128x128xbf16, #tpu.memory_space<vmem>>, %arg6: memref<1x128xf32, #tpu.memory_space<vmem>>, %arg7: memref<1x512x128xf32, #tpu.memory_space<vmem>>, %arg8: memref<512x128xf32, #tpu.memory_space<vmem>>) attributes {dimension_semantics = [#tpu.dimension_semantics<parallel>, #tpu.dimension_semantics<parallel>, #tpu.dimension_semantics<parallel>, #tpu.dimension_semantics<arbitrary>], iteration_bounds = array<i64: 4, 1, 1, 1>, scalar_prefetch = 0 : i64, scratch_operands = 1 : i64, tpu.core_type = #tpu.core_type<tc>, window_params = [{transform_indices = @transform_0, window_bounds = array<i64: 1, 512, 128>}, {transform_indices = @transform_1, window_bounds = array<i64: 1, 128, 128>}, {transform_indices = @transform_2, window_bounds = array<i64: 1, 128>}, {transform_indices = @transform_3, window_bounds = array<i64: 1, 512, 128>}]} {
    %c0_i32 = arith.constant 0 : i32
    %0 = arith.cmpi eq, %arg3, %c0_i32 : i32
    %1 = arith.extui %0 : i1 to i32
    %c0_i32_0 = arith.constant 0 : i32
    %2 = arith.cmpi ne, %1, %c0_i32_0 : i32
    scf.if %2 {
      %cst_12 = arith.constant 0.000000e+00 : f32
      %14 = vector.broadcast %cst_12 : f32 to vector<512x128xf32>
      %c0_13 = arith.constant 0 : index
      %c0_14 = arith.constant 0 : index
      %15 = vector.load %arg8[%c0_13, %c0_14] : memref<512x128xf32, #tpu.memory_space<vmem>>, vector<512x128xf32>
      tpu.vector_store %arg8[%c0_13, %c0_14], %14 {strides = array<i32>} : memref<512x128xf32, #tpu.memory_space<vmem>>, vector<512x128xf32>,
    } else {
    }
    %c0 = arith.constant 0 : index
    %c0_1 = arith.constant 0 : index
    %3 = vector.load %arg8[%c0, %c0_1] : memref<512x128xf32, #tpu.memory_space<vmem>>, vector<512x128xf32>
    %c0_2 = arith.constant 0 : index
    %c0_3 = arith.constant 0 : index
    %c0_4 = arith.constant 0 : index
    %4 = vector.load %arg4[%c0_2, %c0_3, %c0_4] : memref<1x512x128xbf16, #tpu.memory_space<vmem>>, vector<1x512x128xbf16>
    %5 = vector.shape_cast %4 : vector<1x512x128xbf16> to vector<512x128xbf16>
    %c0_5 = arith.constant 0 : index
    %c0_6 = arith.constant 0 : index
    %c0_7 = arith.constant 0 : index
    %6 = vector.load %arg5[%c0_5, %c0_6, %c0_7] : memref<1x128x128xbf16, #tpu.memory_space<vmem>>, vector<1x128x128xbf16>
    %7 = vector.shape_cast %6 : vector<1x128x128xbf16> to vector<128x128xbf16>
    %cst = arith.constant dense<0.000000e+00> : vector<512x128xf32>
    %8 = tpu.matmul %5, %7, %cst {dimension_numbers = #tpu.dot_dimension_numbers<[1], [0], [0], [1], [0, 0, 1, 1], [], []>} : vector<512x128xbf16>, vector<128x128xbf16>, vector<512x128xf32> -> vector<512x128xf32>
    %9 = arith.addf %3, %8 : vector<512x128xf32>
    %c0_8 = arith.constant 0 : index
    %c0_9 = arith.constant 0 : index
    %10 = vector.load %arg8[%c0_8, %c0_9] : memref<512x128xf32, #tpu.memory_space<vmem>>, vector<512x128xf32>
    tpu.vector_store %arg8[%c0_8, %c0_9], %9 {strides = array<i32>} : memref<512x128xf32, #tpu.memory_space<vmem>>, vector<512x128xf32>,
    %c0_i32_10 = arith.constant 0 : i32
    %11 = arith.cmpi eq, %arg3, %c0_i32_10 : i32
    %12 = arith.extui %11 : i1 to i32
    %c0_i32_11 = arith.constant 0 : i32
    %13 = arith.cmpi ne, %12, %c0_i32_11 : i32
    scf.if %13 {
      %c0_12 = arith.constant 0 : index
      %c0_13 = arith.constant 0 : index
      %14 = vector.load %arg8[%c0_12, %c0_13] : memref<512x128xf32, #tpu.memory_space<vmem>>, vector<512x128xf32>
      %c0_14 = arith.constant 0 : index
      %c0_15 = arith.constant 0 : index
      %15 = vector.load %arg6[%c0_14, %c0_15] : memref<1x128xf32, #tpu.memory_space<vmem>>, vector<1x128xf32>
      %16 = vector.broadcast %15 : vector<1x128xf32> to vector<512x128xf32>
      %17 = arith.addf %14, %16 : vector<512x128xf32>
      %18 = math.tanh %17 : vector<512x128xf32>
      %c0_16 = arith.constant 0 : index
      %c0_17 = arith.constant 0 : index
      %c0_18 = arith.constant 0 : index
      %19 = vector.load %arg7[%c0_16, %c0_17, %c0_18] : memref<1x512x128xf32, #tpu.memory_space<vmem>>, vector<1x512x128xf32>
      %20 = vector.shape_cast %19 : vector<1x512x128xf32> to vector<512x128xf32>
      %21 = vector.shape_cast %18 : vector<512x128xf32> to vector<1x512x128xf32>
      tpu.vector_store %arg7[%c0_16, %c0_17, %c0_18], %21 {strides = array<i32>} : memref<1x512x128xf32, #tpu.memory_space<vmem>>, vector<1x512x128xf32>,
    } else {
    }
    return
  }
  func.func @transform_0(%arg0: i32, %arg1: i32, %arg2: i32, %arg3: i32) -> (i32, i32, i32) {
    %c0_i32 = arith.constant 0 : i32
    return %arg0, %arg1, %arg3 : i32, i32, i32
  }
  func.func @transform_1(%arg0: i32, %arg1: i32, %arg2: i32, %arg3: i32) -> (i32, i32, i32) {
    %c0_i32 = arith.constant 0 : i32
    return %arg0, %arg3, %arg2 : i32, i32, i32
  }
  func.func @transform_2(%arg0: i32, %arg1: i32, %arg2: i32, %arg3: i32) -> (i32, i32) {
    %c0_i32 = arith.constant 0 : i32
    %c0_i32_0 = arith.constant 0 : i32
    return %c0_i32, %arg2 : i32, i32
  }
  func.func @transform_3(%arg0: i32, %arg1: i32, %arg2: i32, %arg3: i32) -> (i32, i32, i32) {
    %c0_i32 = arith.constant 0 : i32
    return %arg0, %arg1, %arg2 : i32, i32, i32
  }
}

</mosaic_0001>

<bundles_post_ra>
// kernel: tile.18
= control target key start
LH: loop header
LB: loop body
LE: loop exit
PB: predicated region body
PF: predicated region fallthrough
CT: control target
= control target key end

     0   :  { %s28_s0 = inlined_call_operand.vmem [shape: f32[128], index: 0, kind: input, shape index: {}]   ;;  %s29_s1 = inlined_call_operand.vmem [shape: f32[16,128], index: 1, kind: output, shape index: {}]  }
   0x1   :  { %v4_v0 = vld [vmem:[%s28_s0] ss:$0 sm:$0xff] }
   0x2   :  { %5 = vst [vmem:[%s29_s1] sm:$0xff] %v4_v0  ;;  %8 = vst [vmem:[%s29_s1 + $0x8] sm:$0xff] %v4_v0 }

// kernel: decoder_forward.4
= control target key start
LH: loop header
LB: loop body
LE: loop exit
PB: predicated region body
PF: predicated region fallthrough
CT: control target
= control target key end

     0   :  { %v921_v3 = vmov 0.0   ;;  %vm163_vm0 = vcmask 261120   ;;  %s1203_s1 = inlined_call_operand.vmem [shape: f32[32,2048], index: 1, kind: input, shape index: {}]   ;;  %s1204_s0 = inlined_call_operand.vmem [shape: f32[2,32], index: 0, kind: input, shape index: {}]   ;;  %s1205_s2 = inlined_call_operand.vmem [shape: f32[1,2048], index: 2, kind: input, shape index: {}]   ;;  %s1206_s3 = inlined_call_operand.vmem [shape: f32[2,2048], index: 3, kind: output, shape index: {}]  }
   0x1   :  { %v16_v0 = vld [vmem:[%s1203_s1 + $0x8] sm:$0xff]  ;;  %v18_v2 = vld [vmem:[%s1203_s1 + $0x18] sm:$0xff]  ;;  %231 = vmatprep.mubr.f32.mxu0 %v921_v3  ;;  %302 = vmatprep.mubr.f32.mxu1 %v921_v3  ;;  %v15_v6 = vld [vmem:[%s1203_s1] sm:$0xff] }
   0x2   :  { %v32_v1 = vld [vmem:[%s1203_s1 + $0x88] sm:$0xff]  ;;  %v34_v5 = vld [vmem:[%s1203_s1 + $0x98] sm:$0xff]  ;;  %v31_v7 = vld [vmem:[%s1203_s1 + $0x80] sm:$0xff] }
   0x3   :  { %v855_v4 = vpack.c.bf16 %v32_v1, %v16_v0  ;;  %v863_v8 = vpack.c.bf16 %v34_v5, %v18_v2  ;;  %v857_v9 = vpack.c.bf16 %v31_v7, %v15_v6  ;;  %v17_v10 = vld [vmem:[%s1203_s1 + $0x10] sm:$0xff]  ;;  %v48_v12 = vld [vmem:[%s1203_s1 + $0x108] sm:$0xff]  ;;  %v50_v15 = vld [vmem:[%s1203_s1 + $0x118] sm:$0xff] }
   0x4   :  { %v33_v11 = vld [vmem:[%s1203_s1 + $0x90] sm:$0xff]  ;;  %v64_v14 = vld [vmem:[%s1203_s1 + $0x188] sm:$0xff]  ;;  %v66_v16 = vld [vmem:[%s1203_s1 + $0x198] sm:$0xff] }
   0x5   :  { %856 = vmatprep.subr.bf16.mxu0 %v855_v4  ;;  %v865_v13 = vpack.c.bf16 %v33_v11, %v17_v10  ;;  %864 = vmatprep.subr.bf16.mxu1 %v863_v8  ;;  %v859_v17 = vpack.c.bf16 %v64_v14, %v48_v12  ;;  %v867_v18 = vpack.c.bf16 %v66_v16, %v50_v15  ;;  %v47_v19 = vld [vmem:[%s1203_s1 + $0x100] sm:$0xff]  ;;  %v49_v21 = vld [vmem:[%s1203_s1 + $0x110] sm:$0xff]  ;;  %v20_v24 = vld [vmem:[%s1203_s1 + $0x28] sm:$0xff] }
   0x6   :  { %858 = vmatpush1.bf16.msra.mxu0 %v857_v9  ;;  %v63_v20 = vld [vmem:[%s1203_s1 + $0x180] sm:$0xff]  ;;  %v65_v23 = vld [vmem:[%s1203_s1 + $0x190] sm:$0xff]  ;;  %v36_v27 = vld [vmem:[%s1203_s1 + $0xa8] sm:$0xff] }
   0x7   :  { %866 = vmatpush1.bf16.msra.mxu1 %v865_v13  ;;  %v861_v22 = vpack.c.bf16 %v63_v20, %v47_v19  ;;  %860 = vmatprep.subr.bf16.mxu0 %v859_v17  ;;  %v869_v25 = vpack.c.bf16 %v65_v23, %v49_v21  ;;  %v999_v26 = vld [vmem:[%s1204_s0] sm:$0x3]  ;;  %v22_v28 = vld [vmem:[%s1203_s1 + $0x38] sm:$0xff]  ;;  %v871_v30 = vpack.c.bf16 %v36_v27, %v20_v24  ;;  %v21_v34 = vld [vmem:[%s1203_s1 + $0x30] sm:$0xff] }
   0x8   :  { %868 = vmatprep.subr.bf16.mxu1 %v867_v18  ;;  %v38_v29 = vld [vmem:[%s1203_s1 + $0xb8] sm:$0xff]  ;;  %v19_v32 = vld [vmem:[%s1203_s1 + $0x20] sm:$0xff]  ;;  %v37_v36 = vld [vmem:[%s1203_s1 + $0xb0] sm:$0xff] }
   0x9   :  { %v879_v31 = vpack.c.bf16 %v38_v29, %v22_v28  ;;  %v35_v33 = vld [vmem:[%s1203_s1 + $0xa0] sm:$0xff]  ;;  %v52_v37 = vld [vmem:[%s1203_s1 + $0x128] sm:$0xff]  ;;  %v881_v39 = vpack.c.bf16 %v37_v36, %v21_v34  ;;  %v54_v41 = vld [vmem:[%s1203_s1 + $0x138] sm:$0xff]  ;;  %v83_v36 = vlaneseq }
   0xa   :  { %862 = vmatpush1.bf16.msra.mxu0 %v861_v22  ;;  %v873_v35 = vpack.c.bf16 %v35_v33, %v19_v32  ;;  %v68_v38 = vld [vmem:[%s1203_s1 + $0x1a8] sm:$0xff]  ;;  %v70_v42 = vld [vmem:[%s1203_s1 + $0x1b8] sm:$0xff]  ;;  %v51_v43 = vld [vmem:[%s1203_s1 + $0x120] sm:$0xff] }
   0xb   :  { %870 = vmatpush1.bf16.msra.mxu1 %v869_v25  ;;  %872 = vmatprep.subr.bf16.mxu0 %v871_v30  ;;  %v875_v40 = vpack.c.bf16 %v68_v38, %v52_v37  ;;  %v883_v44 = vpack.c.bf16 %v70_v42, %v54_v41  ;;  %v67_v45 = vld [vmem:[%s1203_s1 + $0x1a0] sm:$0xff]  ;;  %v53_v46 = vld [vmem:[%s1203_s1 + $0x130] sm:$0xff]  ;;  %v24_v48 = vld [vmem:[%s1203_s1 + $0x48] sm:$0xff]  ;;  %v1164_v37 = vshrl.u32 %v83_v36, 7  ;;  %v922_v42 = vmov 1983009808  }
   0xc   :  { %880 = vmatprep.subr.bf16.mxu1 %v879_v31  ;;  %v69_v47 = vld [vmem:[%s1203_s1 + $0x1b0] sm:$0xff]  ;;  %v40_v49 = vld [vmem:[%s1203_s1 + $0xc8] sm:$0xff]  ;;  %v26_v50 = vld [vmem:[%s1203_s1 + $0x58] sm:$0xff]  ;;  %v877_v51 = vpack.c.bf16 %v67_v45, %v51_v43  ;;  %v770_v43 = vunpack.c.l.s4 %v922_v42 }
   0xd   :  { %847 = vmatmul.mubr.msk.f32.vlgmr.msra.gmra.mrb[0].mxu0 %vm163_vm0, %v999_v26  ;;  %v42_v52 = vld [vmem:[%s1203_s1 + $0xd8] sm:$0xff]  ;;  %v885_v53 = vpack.c.bf16 %v69_v47, %v53_v46  ;;  %v887_v54 = vpack.c.bf16 %v40_v49, %v24_v48  ;;  %v23_v55 = vld [vmem:[%s1203_s1 + $0x40] sm:$0xff]  ;;  %v25_v57 = vld [vmem:[%s1203_s1 + $0x50] sm:$0xff]  ;;  %v85_v38 = vsub.s32 0, %v1164_v37  ;;  %v97_v41 = vsub.s32 3, %v1164_v37 }
   0xe   :  { %848 = vmatmul.mubr.msk.f32.vlgmr.msra.gmra.mrb[0].mxu1 %vm163_vm0, %v999_v26  ;;  %874 = vmatpush1.bf16.msra.mxu0 %v873_v35  ;;  %v39_v56 = vld [vmem:[%s1203_s1 + $0xc0] sm:$0xff]  ;;  %v895_v58 = vpack.c.bf16 %v42_v52, %v26_v50  ;;  %v41_v59 = vld [vmem:[%s1203_s1 + $0xd0] sm:$0xff]  ;;  %v56_v60 = vld [vmem:[%s1203_s1 + $0x148] sm:$0xff]  ;;  %v771_v48 = vunpack.c.0.s8 %v770_v43  ;;  %v101_v52 = vsub.s32 4, %v1164_v37 }
   0xf   :  { %882 = vmatpush1.bf16.msra.mxu1 %v881_v39  ;;  %876 = vmatprep.subr.bf16.mxu0 %v875_v40  ;;  %v72_v61 = vld [vmem:[%s1203_s1 + $0x1c8] sm:$0xff]  ;;  %v58_v62 = vld [vmem:[%s1203_s1 + $0x158] sm:$0xff]  ;;  %v889_v0 = vpack.c.bf16 %v39_v56, %v23_v55  ;;  %v897_v1 = vpack.c.bf16 %v41_v59, %v25_v57  ;;  %v55_v4 = vld [vmem:[%s1203_s1 + $0x140] sm:$0xff]  ;;  %v93_v40 = vsub.s32 2, %v1164_v37  ;;  %v109_v56 = vsub.s32 6, %v1164_v37 }
  0x10   :  { %884 = vmatprep.subr.bf16.mxu1 %v883_v44  ;;  %373 = vmatprep.mubr.f32.mxu0 %v921_v3  ;;  %v74_v63 = vld [vmem:[%s1203_s1 + $0x1d8] sm:$0xff]  ;;  %v891_v2 = vpack.c.bf16 %v72_v61, %v56_v60  ;;  %v71_v5 = vld [vmem:[%s1203_s1 + $0x1c0] sm:$0xff]  ;;  %v57_v6 = vld [vmem:[%s1203_s1 + $0x150] sm:$0xff]  ;;  %v105_v57 = vsub.s32 5, %v1164_v37  ;;  %v113_v60 = vsub.s32 7, %v1164_v37 }
  0x11   :  { %444 = vmatprep.mubr.f32.mxu1 %v921_v3  ;;  %v899_v7 = vpack.c.bf16 %v74_v63, %v58_v62  ;;  %v73_v8 = vld [vmem:[%s1203_s1 + $0x1d0] sm:$0xff]  ;;  %v28_v9 = vld [vmem:[%s1203_s1 + $0x68] sm:$0xff]  ;;  %v30_v11 = vld [vmem:[%s1203_s1 + $0x78] sm:$0xff]  ;;  %v893_v13 = vpack.c.bf16 %v71_v5, %v55_v4  ;;  %v1178_v63 = vsub.s32 %v771_v48, %v1164_v37 }
  0x12   :  { %878 = vmatpush1.bf16.msra.mxu0 %v877_v51  ;;  %v44_v10 = vld [vmem:[%s1203_s1 + $0xe8] sm:$0xff]  ;;  %v46_v12 = vld [vmem:[%s1203_s1 + $0xf8] sm:$0xff]  ;;  %v901_v14 = vpack.c.bf16 %v73_v8, %v57_v6  ;;  %v27_v16 = vld [vmem:[%s1203_s1 + $0x60] sm:$0xff] }
  0x13   :  { %886 = vmatpush1.bf16.msra.mxu1 %v885_v53  ;;  %888 = vmatprep.subr.bf16.mxu0 %v887_v54  ;;  %v903_v15 = vpack.c.bf16 %v44_v10, %v28_v9  ;;  %v43_v17 = vld [vmem:[%s1203_s1 + $0xe0] sm:$0xff]  ;;  %v29_v18 = vld [vmem:[%s1203_s1 + $0x70] sm:$0xff]  ;;  %v911_v19 = vpack.c.bf16 %v46_v12, %v30_v11  ;;  %v60_v21 = vld [vmem:[%s1203_s1 + $0x168] sm:$0xff] }
  0x14   :  { %896 = vmatprep.subr.bf16.mxu1 %v895_v58  ;;  %v45_v20 = vld [vmem:[%s1203_s1 + $0xf0] sm:$0xff]  ;;  %v76_v22 = vld [vmem:[%s1203_s1 + $0x1e8] sm:$0xff]  ;;  %v62_v23 = vld [vmem:[%s1203_s1 + $0x178] sm:$0xff]  ;;  %v905_v25 = vpack.c.bf16 %v43_v17, %v27_v16 }
  0x15   :  { %849 = vmatmul.mubr.msk.f32.vlgmr.msra.gmra.mrb[2].mxu0 %vm163_vm0, %v999_v26  ;;  %v78_v24 = vld [vmem:[%s1203_s1 + $0x1f8] sm:$0xff]  ;;  %v913_v27 = vpack.c.bf16 %v45_v20, %v29_v18  ;;  %v907_v28 = vpack.c.bf16 %v76_v22, %v60_v21  ;;  %v59_v29 = vld [vmem:[%s1203_s1 + $0x160] sm:$0xff]  ;;  %v61_v32 = vld [vmem:[%s1203_s1 + $0x170] sm:$0xff] }
  0x16   :  { %850 = vmatmul.mubr.msk.f32.vlgmr.msra.gmra.mrb[2].mxu1 %vm163_vm0, %v999_v26  ;;  %890 = vmatpush1.bf16.msra.mxu0 %v889_v0  ;;  %v75_v30 = vld [vmem:[%s1203_s1 + $0x1e0] sm:$0xff]  ;;  %v915_v31 = vpack.c.bf16 %v78_v24, %v62_v23  ;;  %v77_v33 = vld [vmem:[%s1203_s1 + $0x1f0] sm:$0xff]  ;;  %v80_v17 = vld [vmem:[%s1205_s2 + $0x8] sm:$0xff] }
  0x17   :  { %898 = vmatpush1.bf16.msra.mxu1 %v897_v1  ;;  %892 = vmatprep.subr.bf16.mxu0 %v891_v2  ;;  %v909_v34 = vpack.c.bf16 %v75_v30, %v59_v29  ;;  %v917_v35 = vpack.c.bf16 %v77_v33, %v61_v32  ;;  %v79_v39 = vld [vmem:[%s1205_s2] sm:$0xff]  ;;  %v118_v24 = vrot.slane %v80_v17, %v85_v38 }
  0x18   :  { %900 = vmatprep.subr.bf16.mxu1 %v899_v7  ;;  %515 = vmatprep.mubr.f32.mxu0 %v921_v3  ;;  %v86_v44 = vrot.slane %v79_v39, %v85_v38  ;;  %v94_v45 = vrot.slane %v79_v39, %v93_v40  ;;  %v98_v46 = vrot.slane %v79_v39, %v97_v41 }
  0x19   :  { %586 = vmatprep.mubr.f32.mxu1 %v921_v3  ;;  %v102_v1 = vrot.slane %v79_v39, %v101_v52  ;;  %v110_v4 = vrot.slane %v79_v39, %v109_v56  ;;  %v106_v5 = vrot.slane %v79_v39, %v105_v57  ;;  %v114_v7 = vrot.slane %v79_v39, %v113_v60 }
  0x1a   :  { %894 = vmatpush1.bf16.msra.mxu0 %v893_v13  ;;  %v130_v30 = vrot.slane %v80_v17, %v97_v41 }
  0x1b   :  { %902 = vmatpush1.bf16.msra.mxu1 %v901_v14  ;;  %904 = vmatprep.subr.bf16.mxu0 %v903_v15 }
  0x1c   :  { %912 = vmatprep.subr.bf16.mxu1 %v911_v19 }
  0x1d   :  { %851 = vmatmul.mubr.msk.f32.vlgmr.msra.gmra.mrb[4].mxu0 %vm163_vm0, %v999_v26 }
  0x1e   :  { %852 = vmatmul.mubr.msk.f32.vlgmr.msra.gmra.mrb[4].mxu1 %vm163_vm0, %v999_v26  ;;  %906 = vmatpush1.bf16.msra.mxu0 %v905_v25 }
  0x1f   :  { %914 = vmatpush1.bf16.msra.mxu1 %v913_v27  ;;  %908 = vmatprep.subr.bf16.mxu0 %v907_v28  ;;  %v126_v27 = vrot.slane %v80_v17, %v93_v40 }
  0x20   :  { %916 = vmatprep.subr.bf16.mxu1 %v915_v31  ;;  %657 = vmatprep.mubr.f32.mxu0 %v921_v3 }
  0x21   :  { %728 = vmatprep.mubr.f32.mxu1 %v921_v3  ;;  %v89_v3 = vsub.s32 1, %v1164_v37 }
  0x22   :  { %910 = vmatpush1.bf16.msra.mxu0 %v909_v34 }
  0x23   :  { %918 = vmatpush1.bf16.msra.mxu1 %v917_v35  ;;  %v122_v28 = vrot.slane %v80_v17, %v89_v3 }
  0x25   :  { %853 = vmatmul.mubr.msk.f32.vlgmr.msra.gmra.mrb[6].mxu0 %vm163_vm0, %v999_v26 }
  0x26   :  { %854 = vmatmul.mubr.msk.f32.vlgmr.msra.gmra.mrb[6].mxu1 %vm163_vm0, %v999_v26  ;;  %v90_v26 = vrot.slane %v79_v39, %v89_v3  ;;  %v134_v3 = vrot.slane %v80_v17, %v101_v52 }
  0xe0   :  { %v233_v47 = vpop.f32.mrb[0].mxu0 }
  0xe1   :  { %v234_v49 = vadd.f32 %v233_v47, %v86_v44  ;;  %v304_v50 = vpop.f32.mrb[0].mxu1  ;;  %v235_v51 = vpop.f32.mrb[1].mxu0  ;;  %v138_v47 = vrot.slane %v80_v17, %v105_v57 }
  0xe2   :  { %v305_v53 = vadd.f32 %v304_v50, %v94_v45  ;;  %v236_v54 = vadd.f32 %v235_v51, %v90_v26  ;;  %v306_v55 = vpop.f32.mrb[1].mxu1 }
  0xe3   :  { %v735_v58 = vmax.f32 %v234_v49, 0.0  ;;  %v307_v59 = vadd.f32 %v306_v55, %v98_v46  ;;  %v142_v46 = vrot.slane %v80_v17, %v109_v56  ;;  %v146_v49 = vrot.slane %v80_v17, %v113_v60 }
  0xe4   :  { %v737_v61 = vmax.f32 %v305_v53, 0.0  ;;  %v736_v62 = vmax.f32 %v236_v54, 0.0 }
  0xe5   :  { %v738_v0 = vmax.f32 %v307_v59, 0.0 }
  0xe6   :  { %v767_v2 = vcombine.low %v735_v58, %v736_v62 }
  0xe7   :  { %v768_v6 = vcombine.low %v737_v61, %v738_v0 }
  0xe8   :  { %v775_v8 = vrot.slane %v767_v2, %v1178_v63  ;;  %v375_v9 = vpop.f32.mrb[2].mxu0 }
  0xe9   :  { %v782_v10 = vrot.slane %v768_v6, %v1178_v63  ;;  %v376_v11 = vadd.f32 %v375_v9, %v102_v1  ;;  %v446_v12 = vpop.f32.mrb[2].mxu1  ;;  %v377_v13 = vpop.f32.mrb[3].mxu0 }
  0xea   :  { %v447_v14 = vadd.f32 %v446_v12, %v110_v4  ;;  %v378_v15 = vadd.f32 %v377_v13, %v106_v5  ;;  %v448_v16 = vpop.f32.mrb[3].mxu1 }
  0xeb   :  { %v783_v18 = vcombine.low %v775_v8, %v782_v10  ;;  %v739_v19 = vmax.f32 %v376_v11, 0.0  ;;  %v449_v20 = vadd.f32 %v448_v16, %v114_v7 }
  0xec   :  { %v741_v21 = vmax.f32 %v447_v14, 0.0  ;;  %v740_v22 = vmax.f32 %v378_v15, 0.0 }
  0xed   :  { %839 = vst [vmem:[%s1206_s3] sm:$0xff] %v783_v18  ;;  %v742_v23 = vmax.f32 %v449_v20, 0.0 }
  0xee   :  { %v784_v25 = vcombine.low %v739_v19, %v740_v22 }
  0xef   :  { %v785_v29 = vcombine.low %v741_v21, %v742_v23 }
  0xf0   :  { %v792_v31 = vrot.slane %v784_v25, %v1178_v63  ;;  %v517_v32 = vpop.f32.mrb[4].mxu0 }
  0xf1   :  { %v799_v33 = vrot.slane %v785_v29, %v1178_v63  ;;  %v518_v34 = vadd.f32 %v517_v32, %v118_v24  ;;  %v588_v35 = vpop.f32.mrb[4].mxu1  ;;  %v519_v36 = vpop.f32.mrb[5].mxu0 }
  0xf2   :  { %v589_v37 = vadd.f32 %v588_v35, %v126_v27  ;;  %v520_v39 = vadd.f32 %v519_v36, %v122_v28  ;;  %v590_v42 = vpop.f32.mrb[5].mxu1 }
  0xf3   :  { %v800_v43 = vcombine.low %v792_v31, %v799_v33  ;;  %v743_v44 = vmax.f32 %v518_v34, 0.0  ;;  %v591_v45 = vadd.f32 %v590_v42, %v130_v30 }
  0xf4   :  { %v745_v38 = vmax.f32 %v589_v37, 0.0  ;;  %v744_v26 = vmax.f32 %v520_v39, 0.0 }
  0xf5   :  { %840 = vst [vmem:[%s1206_s3 + $0x8] sm:$0xff] %v800_v43  ;;  %v746_v40 = vmax.f32 %v591_v45, 0.0 }
  0xf6   :  { %v801_v41 = vcombine.low %v743_v44, %v744_v26 }
  0xf7   :  { %v802_v48 = vcombine.low %v745_v38, %v746_v40 }
  0xf8   :  { %v809_v50 = vrot.slane %v801_v41, %v1178_v63  ;;  %v659_v51 = vpop.f32.mrb[6].mxu0 }
  0xf9   :  { %v816_v53 = vrot.slane %v802_v48, %v1178_v63  ;;  %v660_v54 = vadd.f32 %v659_v51, %v134_v3  ;;  %v730_v55 = vpop.f32.mrb[6].mxu1  ;;  %v661_v58 = vpop.f32.mrb[7].mxu0 }
  0xfa   :  { %v731_v59 = vadd.f32 %v730_v55, %v142_v46  ;;  %v662_v61 = vadd.f32 %v661_v58, %v138_v47  ;;  %v732_v62 = vpop.f32.mrb[7].mxu1 }
  0xfb   :  { %v817_v0 = vcombine.low %v809_v50, %v816_v53  ;;  %v747_v1 = vmax.f32 %v660_v54, 0.0  ;;  %v733_v2 = vadd.f32 %v732_v62, %v146_v49 }
  0xfc   :  { %v749_v52 = vmax.f32 %v731_v59, 0.0  ;;  %v748_v4 = vmax.f32 %v662_v61, 0.0 }
  0xfd   :  { %841 = vst [vmem:[%s1206_s3 + $0x10] sm:$0xff] %v817_v0  ;;  %v750_v56 = vmax.f32 %v733_v2, 0.0 }
  0xfe   :  { %v818_v57 = vcombine.low %v747_v1, %v748_v4 }
  0xff   :  { %v819_v60 = vcombine.low %v749_v52, %v750_v56 }
 0x100   :  { %v826_v5 = vrot.slane %v818_v57, %v1178_v63 }
 0x101   :  { %v833_v6 = vrot.slane %v819_v60, %v1178_v63 }
 0x103   :  { %v834_v7 = vcombine.low %v826_v5, %v833_v6 }
 0x105   :  { %842 = vst [vmem:[%s1206_s3 + $0x18] sm:$0xff] %v834_v7 }

// kernel: decoder_forward.5
= control target key start
LH: loop header
LB: loop body
LE: loop exit
PB: predicated region body
PF: predicated region fallthrough
CT: control target
= control target key end

     0   :  { %s1129_s12 = smov 0   ;;  %s1131_s13 = smov 0   ;;  %s1207_s0 = inlined_call_operand.vmem [shape: bf16[4,32,512], index: 0, kind: input, shape index: {}]   ;;  %s1208_s1 = inlined_call_operand.vmem [shape: bf16[4,512,128], index: 1, kind: input, shape index: {}]   ;;  %s1209_s2 = inlined_call_operand.vmem [shape: f32[1,128], index: 2, kind: input, shape index: {}]   ;;  %s1210_s3 = inlined_call_operand.vmem [shape: f32[4,32,128], index: 3, kind: output, shape index: {}]  }
   0x1   :  { %s1133_s14 = smov 0  }
   0x2 LB: > { %s39_s15 = sadd.s32 1, %s1103_s13  ;;  %p908_p0 = scmp.ge.s32.totalorder %s1107_s14, 1  ;;  %s1107_s14 = sphi %s1133_s14, %s13_s14   ;;  %s1103_s13 = sphi %s1131_s13, %s1212_s13   ;;  %s1099_s12 = sphi %s1129_s12, %s1211_s12  }
   0x3   : > { %p41_p1 = scmp.ge.s32.totalorder %s39_s15, 4  ;;  %p212_p2 = scmp.lt.s32.totalorder %s1107_s14, 5 }
   0x5   : > { %s1214_s15 = smov (%p41_p1, %s39_s15), 0  ;;  %p213_p3 = pnand %p908_p0, %p212_p2 }
   0x6   : > { %p269_p4 = scmp.lt.s32.totalorder (!%p213_p3), %s1099_s12, 3  ;;  %v955_v49 = vld [vmem:[%s1209_s2] ss:$0 sm:$0xff] (!%p213_p3) }
   0x7   : > { %216 = sbr.rel (%p213_p3) target bundleno = 284 (0x11c), region = 32 }
   0xe   : > { %s1216_s12 = smov (!%p269_p4, %s1099_s12), 3 }
   0xf   : > { %s959_s16 = sshll.u32 %s1216_s12, 8  ;;  %s958_s20 = sshll.u32 %s1216_s12, 6 }
  0x10   : > { %s1153_s19 = scalar_lea.vmem %s1208_s1, %s959_s16  ;;  %s280_s23 = scalar_lea.vmem %s1207_s0, %s958_s20 }
  0x11   : > { %v1041_v0 = vld [vmem:[%s1153_s19 + $0x40] sm:$0xff]   ;;  %v1045_v4 = vld [vmem:[%s1153_s19 + $0x48] sm:$0xff]   ;;  %v1049_v8 = vld [vmem:[%s1153_s19 + $0x50] sm:$0xff]   ;;  %s960_s26 = sshll.u32 %s1216_s12, 5 }
  0x12   : > { %v1042_v1 = vld [vmem:[%s1153_s19 + $0xc0] sm:$0xff]   ;;  %961 = vmatprep.subr.bf16.mxu0 %v1041_v0  ;;  %v1046_v5 = vld [vmem:[%s1153_s19 + $0xc8] sm:$0xff]   ;;  %v1050_v9 = vld [vmem:[%s1153_s19 + $0xd0] sm:$0xff]   ;;  %s310_s29 = scalar_lea.vmem %s1210_s3, %s960_s26 }
  0x13   : > { %v1043_v2 = vld [vmem:[%s1153_s19] sm:$0xff]   ;;  %989 = vmatprep.subr.bf16.mxu1 %v1042_v1  ;;  %v1047_v6 = vld [vmem:[%s1153_s19 + $0x8] sm:$0xff]   ;;  %v1051_v10 = vld [vmem:[%s1153_s19 + $0x10] sm:$0xff]  }
  0x14   : > { %v1044_v3 = vld [vmem:[%s1153_s19 + $0x80] sm:$0xff]   ;;  %962 = vmatpush3.bf16.msra.mxu0 %v1043_v2  ;;  %v1048_v7 = vld [vmem:[%s1153_s19 + $0x88] sm:$0xff]   ;;  %v1052_v11 = vld [vmem:[%s1153_s19 + $0x90] sm:$0xff]  }
  0x15   : > { %990 = vmatpush3.bf16.msra.mxu1 %v1044_v3  ;;  %963 = vmatprep.subr.bf16.mxu0 %v1045_v4  ;;  %v1053_v12 = vld [vmem:[%s1153_s19 + $0x58] sm:$0xff]   ;;  %v1057_v16 = vld [vmem:[%s1153_s19 + $0x60] sm:$0xff]   ;;  %v1061_v20 = vld [vmem:[%s1153_s19 + $0x68] sm:$0xff]  }
  0x16   : > { %991 = vmatprep.subr.bf16.mxu1 %v1046_v5  ;;  %v1054_v13 = vld [vmem:[%s1153_s19 + $0xd8] sm:$0xff]   ;;  %v1058_v17 = vld [vmem:[%s1153_s19 + $0xe0] sm:$0xff]   ;;  %v1062_v21 = vld [vmem:[%s1153_s19 + $0xe8] sm:$0xff]  }
  0x17   : > { %v1055_v14 = vld [vmem:[%s1153_s19 + $0x18] sm:$0xff]   ;;  %v1059_v18 = vld [vmem:[%s1153_s19 + $0x20] sm:$0xff]   ;;  %v1063_v22 = vld [vmem:[%s1153_s19 + $0x28] sm:$0xff]  }
  0x18   : > { %964 = vmatpush3.bf16.msra.mxu0 %v1047_v6  ;;  %v1056_v15 = vld [vmem:[%s1153_s19 + $0x98] sm:$0xff]   ;;  %v1060_v19 = vld [vmem:[%s1153_s19 + $0xa0] sm:$0xff]   ;;  %v1064_v23 = vld [vmem:[%s1153_s19 + $0xa8] sm:$0xff]  }
  0x19   : > { %992 = vmatpush3.bf16.msra.mxu1 %v1048_v7  ;;  %965 = vmatprep.subr.bf16.mxu0 %v1049_v8  ;;  %v1065_v24 = vld [vmem:[%s1153_s19 + $0x70] sm:$0xff]   ;;  %v1069_v28 = vld [vmem:[%s1153_s19 + $0x78] sm:$0xff]  }
  0x1a   : > { %993 = vmatprep.subr.bf16.mxu1 %v1050_v9  ;;  %v1066_v25 = vld [vmem:[%s1153_s19 + $0xf0] sm:$0xff]   ;;  %v1070_v29 = vld [vmem:[%s1153_s19 + $0xf8] sm:$0xff]  }
  0x1b   : > { %v1067_v26 = vld [vmem:[%s1153_s19 + $0x30] sm:$0xff]   ;;  %v1071_v30 = vld [vmem:[%s1153_s19 + $0x38] sm:$0xff]  }
  0x1c   : > { %966 = vmatpush3.bf16.msra.mxu0 %v1051_v10  ;;  %v1068_v27 = vld [vmem:[%s1153_s19 + $0xb0] sm:$0xff]   ;;  %v1072_v31 = vld [vmem:[%s1153_s19 + $0xb8] sm:$0xff]  }
  0x1d   : > { %994 = vmatpush3.bf16.msra.mxu1 %v1052_v11  ;;  %967 = vmatprep.subr.bf16.mxu0 %v1053_v12  ;;  %v1073_v32 = vld [vmem:[%s280_s23] ss:$16 sps:$4 sm:$0xff]   ;;  %v1075_v33 = vld [vmem:[%s280_s23 + $0x4] ss:$16 sps:$4 sm:$0xff]   ;;  %v1076_v34 = vld [vmem:[%s280_s23 + $0x8] ss:$16 sps:$4 sm:$0xff]  }
  0x1e   : > { %995 = vmatprep.subr.bf16.mxu1 %v1054_v13  ;;  %v1078_v35 = vld [vmem:[%s280_s23 + $0xc] ss:$16 sps:$4 sm:$0xff]   ;;  %661 = vmatprep.mubr.bf16.mxu0 %v1075_v33  ;;  %v1079_v36 = vld [vmem:[%s280_s23 + $0x24] ss:$16 sps:$4 sm:$0xff]   ;;  %v1083_v38 = vld [vmem:[%s280_s23 + $0x20] ss:$16 sps:$4 sm:$0xff]  }
  0x1f   : > { %710 = vmatprep.mubr.bf16.mxu1 %v1078_v35  ;;  %v1081_v37 = vld [vmem:[%s280_s23 + $0x2c] ss:$16 sps:$4 sm:$0xff]   ;;  %v1084_v39 = vld [vmem:[%s280_s23 + $0x28] ss:$16 sps:$4 sm:$0xff]  }
  0x20   : > { %968 = vmatpush3.bf16.msra.mxu0 %v1055_v14 }
  0x21   : > { %996 = vmatpush3.bf16.msra.mxu1 %v1056_v15  ;;  %969 = vmatprep.subr.bf16.mxu0 %v1057_v16 }
  0x22   : > { %997 = vmatprep.subr.bf16.mxu1 %v1058_v17 }
  0x24   : > { %970 = vmatpush3.bf16.msra.mxu0 %v1059_v18 }
  0x25   : > { %998 = vmatpush3.bf16.msra.mxu1 %v1060_v19  ;;  %971 = vmatprep.subr.bf16.mxu0 %v1061_v20 }
  0x26   : > { %999 = vmatprep.subr.bf16.mxu1 %v1062_v21 }
  0x28   : > { %972 = vmatpush3.bf16.msra.mxu0 %v1063_v22 }
  0x29   : > { %1000 = vmatpush3.bf16.msra.mxu1 %v1064_v23  ;;  %973 = vmatprep.subr.bf16.mxu0 %v1065_v24 }
  0x2a   : > { %1001 = vmatprep.subr.bf16.mxu1 %v1066_v25 }
  0x2c   : > { %974 = vmatpush3.bf16.msra.mxu0 %v1067_v26 }
  0x2d   : > { %1002 = vmatpush3.bf16.msra.mxu1 %v1068_v27  ;;  %975 = vmatprep.subr.bf16.mxu0 %v1069_v28 }
  0x2e   : > { %1003 = vmatprep.subr.bf16.mxu1 %v1070_v29 }
  0x30   : > { %976 = vmatpush3.bf16.msra.mxu0 %v1071_v30 }
  0x31   : > { %1004 = vmatpush3.bf16.msra.mxu1 %v1072_v31 }
  0x33   : > { %662 = vmatmul.mubr.bf16.vlgmr.msra.gmra.mrb[0].mxu0 %v1073_v32 }
  0x34   : > { %711 = vmatmul.mubr.bf16.vlgmr.msra.gmra.mrb[0].mxu1 %v1076_v34  ;;  %669 = vmatprep.mubr.bf16.mxu0 %v1079_v36 }
  0x35   : > { %718 = vmatprep.mubr.bf16.mxu1 %v1081_v37 }
  0x3b   : > { %670 = vmatmul.mubr.bf16.gmra.mrb[4].mxu0 %v1083_v38 }
  0x3c   : > { %719 = vmatmul.mubr.bf16.gmra.mrb[4].mxu1 %v1084_v39 }
 0x106   : > { %v977_v40 = vpop.f32.mrb[0].mxu0 }
 0x107   : > { %v1005_v41 = vpop.f32.mrb[0].mxu1  ;;  %v978_v42 = vpop.f32.mrb[1].mxu0 }
 0x108   : > { %v979_v43 = vadd.f32 %v978_v42, %v977_v40  ;;  %v1006_v44 = vpop.f32.mrb[1].mxu1  ;;  %v980_v45 = vpop.f32.mrb[2].mxu0 }
 0x109   : > { %v1007_v46 = vadd.f32 %v1006_v44, %v1005_v41  ;;  %v1008_v47 = vpop.f32.mrb[2].mxu1  ;;  %v981_v48 = vpop.f32.mrb[3].mxu0 }
 0x10a   : > { %v982_v50 = vadd.f32 %v981_v48, %v980_v45  ;;  %v1009_v51 = vpop.f32.mrb[3].mxu1 }
 0x10b   : > { %v713_v52 = vadd.f32 %v1007_v46, %v979_v43  ;;  %v1010_v53 = vadd.f32 %v1009_v51, %v1008_v47 }
 0x10d   : > { %v749_v54 = vadd.f32 %v955_v49, %v713_v52  ;;  %v716_v55 = vadd.f32 %v1010_v53, %v982_v50 }
 0x10e   : > { %v983_v56 = vpop.f32.mrb[4].mxu0 }
 0x10f   : > { %v753_v57 = vmax.f32 %v749_v54, 0.0  ;;  %v750_v58 = vadd.f32 %v955_v49, %v716_v55  ;;  %v1011_v59 = vpop.f32.mrb[4].mxu1  ;;  %v984_v60 = vpop.f32.mrb[5].mxu0 }
 0x110   : > { %v985_v61 = vadd.f32 %v984_v60, %v983_v56  ;;  %v1012_v62 = vpop.f32.mrb[5].mxu1  ;;  %v986_v63 = vpop.f32.mrb[6].mxu0 }
 0x111   : > { %757 = vst [vmem:[%s310_s29] sm:$0xff] %v753_v57  ;;  %v754_v0 = vmax.f32 %v750_v58, 0.0  ;;  %v1013_v1 = vadd.f32 %v1012_v62, %v1011_v59  ;;  %v1014_v2 = vpop.f32.mrb[6].mxu1  ;;  %v987_v3 = vpop.f32.mrb[7].mxu0 }
 0x112   : > { %v988_v4 = vadd.f32 %v987_v3, %v986_v63  ;;  %v1015_v5 = vpop.f32.mrb[7].mxu1 }
 0x113   : > { %758 = vst [vmem:[%s310_s29 + $0x8] sm:$0xff] %v754_v0  ;;  %v721_v6 = vadd.f32 %v1013_v1, %v985_v61  ;;  %v1016_v7 = vadd.f32 %v1015_v5, %v1014_v2 }
 0x115   : > { %v751_v8 = vadd.f32 %v955_v49, %v721_v6  ;;  %v724_v9 = vadd.f32 %v1016_v7, %v988_v4 }
 0x117   : > { %v755_v10 = vmax.f32 %v751_v8, 0.0  ;;  %v752_v11 = vadd.f32 %v955_v49, %v724_v9 }
 0x119   : > { %759 = vst [vmem:[%s310_s29 + $0x10] sm:$0xff] %v755_v10  ;;  %v756_v12 = vmax.f32 %v752_v11, 0.0 }
 0x11b   : > { %760 = vst [vmem:[%s310_s29 + $0x18] sm:$0xff] %v756_v12 }
 0x11c PF: > { %s13_s14 = sadd.s32 1, %s1107_s14   ;;  %s1211_s12 = smov %s1103_s13 }
 0x11d   : > { %p10_p5 = scmp.ge.s32.totalorder %s13_s14, 6   ;;  %s1212_s13 = smov %s1214_s15 }
 0x11f   :  { %12 = sbr.rel (!%p10_p5) target bundleno = 2 (0x2), region = 76 }

// kernel: decoder_forward.6
= control target key start
LH: loop header
LB: loop body
LE: loop exit
PB: predicated region body
PF: predicated region fallthrough
CT: control target
= control target key end

     0   :  { %s1156_s12 = smov 0   ;;  %s1158_s13 = smov 0   ;;  %s1272_s0 = inlined_call_operand.vmem [shape: bf16[4,128,256], index: 0, kind: input, shape index: {}]   ;;  %s1273_s1 = inlined_call_operand.vmem [shape: bf16[4,256,128], index: 1, kind: input, shape index: {}]   ;;  %s1274_s2 = inlined_call_operand.vmem [shape: f32[1,128], index: 2, kind: input, shape index: {}]   ;;  %s1275_s3 = inlined_call_operand.vmem [shape: f32[4,128,128], index: 3, kind: output, shape index: {}]  }
   0x1   :  { %s1160_s14 = smov 0  }
   0x2 LB: > { %s39_s15 = sadd.s32 1, %s1130_s13  ;;  %p923_p0 = scmp.ge.s32.totalorder %s1134_s14, 1  ;;  %s1134_s14 = sphi %s1160_s14, %s13_s14   ;;  %s1130_s13 = sphi %s1158_s13, %s1277_s13   ;;  %s1126_s12 = sphi %s1156_s12, %s1276_s12  }
   0x3   : > { %p41_p1 = scmp.ge.s32.totalorder %s39_s15, 4  ;;  %p212_p2 = scmp.lt.s32.totalorder %s1134_s14, 5 }
   0x5   : > { %s1279_s15 = smov (%p41_p1, %s39_s15), 0  ;;  %p213_p3 = pnand %p923_p0, %p212_p2 }
   0x6   : > { %p269_p4 = scmp.lt.s32.totalorder (!%p213_p3), %s1126_s12, 3  ;;  %v1223_v35 = vld [vmem:[%s1274_s2] ss:$0 sm:$0xff] (!%p213_p3) }
   0x7   : > { %216 = sbr.rel (%p213_p3) target bundleno = 296 (0x128), region = 32 }
   0xe   : > { %s1281_s12 = smov (!%p269_p4, %s1126_s12), 3 }
   0xf   : > { %s1174_s16 = sshll.u32 %s1281_s12, 7 }
  0x10   : > { %s1180_s19 = scalar_lea.vmem %s1273_s1, %s1174_s16  ;;  %s1195_s22 = scalar_lea.vmem %s1272_s0, %s1174_s16 }
  0x11   : > { %v1072_v0 = vld [vmem:[%s1180_s19 + $0x40] sm:$0xff]   ;;  %v1074_v2 = vld [vmem:[%s1180_s19 + $0x48] sm:$0xff]   ;;  %v1076_v4 = vld [vmem:[%s1180_s19 + $0x50] sm:$0xff]   ;;  %s1231_s27 = scalar_lea.vmem %s1275_s3, %s1174_s16 }
  0x12   : > { %v1073_v1 = vld [vmem:[%s1180_s19] sm:$0xff]   ;;  %968 = vmatprep.subr.bf16.mxu0 %v1072_v0  ;;  %1032 = vmatprep.subr.bf16.mxu1 %v1072_v0  ;;  %v1075_v3 = vld [vmem:[%s1180_s19 + $0x8] sm:$0xff]   ;;  %v1077_v5 = vld [vmem:[%s1180_s19 + $0x10] sm:$0xff]  }
  0x13   : > { %969 = vmatpush3.bf16.msra.mxu0 %v1073_v1  ;;  %1040 = vmatpush3.bf16.msra.mxu1 %v1073_v1  ;;  %v1078_v6 = vld [vmem:[%s1180_s19 + $0x58] sm:$0xff]   ;;  %v1080_v8 = vld [vmem:[%s1180_s19 + $0x60] sm:$0xff]   ;;  %v1082_v10 = vld [vmem:[%s1180_s19 + $0x68] sm:$0xff]  }
  0x14   : > { %970 = vmatprep.subr.bf16.mxu0 %v1074_v2  ;;  %1033 = vmatprep.subr.bf16.mxu1 %v1074_v2  ;;  %v1079_v7 = vld [vmem:[%s1180_s19 + $0x18] sm:$0xff]   ;;  %v1081_v9 = vld [vmem:[%s1180_s19 + $0x20] sm:$0xff]   ;;  %v1083_v13 = vld [vmem:[%s1180_s19 + $0x28] sm:$0xff]  }
  0x15   : > { %v1090_v11 = vld [vmem:[%s1195_s22 + $0x4] ss:$8 sps:$4 sm:$0xff]   ;;  %v1084_v14 = vld [vmem:[%s1180_s19 + $0x70] sm:$0xff]   ;;  %v1086_v16 = vld [vmem:[%s1180_s19 + $0x78] sm:$0xff]  }
  0x16   : > { %v1093_v12 = vld [vmem:[%s1195_s22 + $0x44] ss:$8 sps:$4 sm:$0xff]   ;;  %605 = vmatprep.mubr.bf16.mxu0 %v1090_v11  ;;  %v1085_v15 = vld [vmem:[%s1180_s19 + $0x30] sm:$0xff]   ;;  %v1087_v17 = vld [vmem:[%s1180_s19 + $0x38] sm:$0xff]  }
  0x17   : > { %971 = vmatpush3.bf16.msra.mxu0 %v1075_v3  ;;  %1041 = vmatpush3.bf16.msra.mxu1 %v1075_v3  ;;  %v1088_v18 = vld [vmem:[%s1195_s22] ss:$8 sps:$4 sm:$0xff]   ;;  %v1094_v20 = vld [vmem:[%s1195_s22 + $0x14] ss:$8 sps:$4 sm:$0xff]   ;;  %v1098_v22 = vld [vmem:[%s1195_s22 + $0x10] ss:$8 sps:$4 sm:$0xff]  }
  0x18   : > { %972 = vmatprep.subr.bf16.mxu0 %v1076_v4  ;;  %1034 = vmatprep.subr.bf16.mxu1 %v1076_v4  ;;  %v1091_v19 = vld [vmem:[%s1195_s22 + $0x40] ss:$8 sps:$4 sm:$0xff]   ;;  %v1096_v21 = vld [vmem:[%s1195_s22 + $0x54] ss:$8 sps:$4 sm:$0xff]   ;;  %v1099_v23 = vld [vmem:[%s1195_s22 + $0x50] ss:$8 sps:$4 sm:$0xff]  }
  0x19   : > { %637 = vmatprep.mubr.bf16.mxu1 %v1093_v12  ;;  %v1100_v24 = vld [vmem:[%s1195_s22 + $0x24] ss:$8 sps:$4 sm:$0xff]   ;;  %v1104_v26 = vld [vmem:[%s1195_s22 + $0x20] ss:$8 sps:$4 sm:$0xff]   ;;  %v1106_v28 = vld [vmem:[%s1195_s22 + $0x34] ss:$8 sps:$4 sm:$0xff]  }
  0x1a   : > { %v1102_v25 = vld [vmem:[%s1195_s22 + $0x64] ss:$8 sps:$4 sm:$0xff]   ;;  %v1105_v27 = vld [vmem:[%s1195_s22 + $0x60] ss:$8 sps:$4 sm:$0xff]   ;;  %v1108_v29 = vld [vmem:[%s1195_s22 + $0x74] ss:$8 sps:$4 sm:$0xff]  }
  0x1b   : > { %973 = vmatpush3.bf16.msra.mxu0 %v1077_v5  ;;  %1042 = vmatpush3.bf16.msra.mxu1 %v1077_v5  ;;  %v1110_v30 = vld [vmem:[%s1195_s22 + $0x30] ss:$8 sps:$4 sm:$0xff]  }
  0x1c   : > { %974 = vmatprep.subr.bf16.mxu0 %v1078_v6  ;;  %1035 = vmatprep.subr.bf16.mxu1 %v1078_v6  ;;  %v1111_v31 = vld [vmem:[%s1195_s22 + $0x70] ss:$8 sps:$4 sm:$0xff]  }
  0x1f   : > { %975 = vmatpush3.bf16.msra.mxu0 %v1079_v7  ;;  %1043 = vmatpush3.bf16.msra.mxu1 %v1079_v7 }
  0x20   : > { %976 = vmatprep.subr.bf16.mxu0 %v1080_v8  ;;  %1036 = vmatprep.subr.bf16.mxu1 %v1080_v8 }
  0x23   : > { %977 = vmatpush3.bf16.msra.mxu0 %v1081_v9  ;;  %1044 = vmatpush3.bf16.msra.mxu1 %v1081_v9 }
  0x24   : > { %978 = vmatprep.subr.bf16.mxu0 %v1082_v10  ;;  %1037 = vmatprep.subr.bf16.mxu1 %v1082_v10 }
  0x27   : > { %979 = vmatpush3.bf16.msra.mxu0 %v1083_v13  ;;  %1045 = vmatpush3.bf16.msra.mxu1 %v1083_v13 }
  0x28   : > { %980 = vmatprep.subr.bf16.mxu0 %v1084_v14  ;;  %1038 = vmatprep.subr.bf16.mxu1 %v1084_v14 }
  0x2b   : > { %981 = vmatpush3.bf16.msra.mxu0 %v1085_v15  ;;  %1046 = vmatpush3.bf16.msra.mxu1 %v1085_v15 }
  0x2c   : > { %982 = vmatprep.subr.bf16.mxu0 %v1086_v16  ;;  %1039 = vmatprep.subr.bf16.mxu1 %v1086_v16 }
  0x2f   : > { %983 = vmatpush3.bf16.msra.mxu0 %v1087_v17  ;;  %1047 = vmatpush3.bf16.msra.mxu1 %v1087_v17 }
  0x32   : > { %606 = vmatmul.mubr.bf16.vlgmr.msra.gmra.mrb[0].mxu0 %v1088_v18  ;;  %638 = vmatmul.mubr.bf16.vlgmr.msra.gmra.mrb[0].mxu1 %v1091_v19 }
  0x33   : > { %613 = vmatprep.mubr.bf16.mxu0 %v1094_v20  ;;  %645 = vmatprep.mubr.bf16.mxu1 %v1096_v21 }
  0x3a   : > { %614 = vmatmul.mubr.bf16.gmra.mrb[4].mxu0 %v1098_v22  ;;  %646 = vmatmul.mubr.bf16.gmra.mrb[4].mxu1 %v1099_v23 }
  0x3b   : > { %621 = vmatprep.mubr.bf16.mxu0 %v1100_v24  ;;  %653 = vmatprep.mubr.bf16.mxu1 %v1102_v25 }
  0x42   : > { %622 = vmatmul.mubr.bf16.gmra.mrb[8].mxu0 %v1104_v26  ;;  %654 = vmatmul.mubr.bf16.gmra.mrb[8].mxu1 %v1105_v27 }
  0x43   : > { %629 = vmatprep.mubr.bf16.mxu0 %v1106_v28  ;;  %661 = vmatprep.mubr.bf16.mxu1 %v1108_v29 }
  0x4a   : > { %630 = vmatmul.mubr.bf16.gmra.mrb[12].mxu0 %v1110_v30  ;;  %662 = vmatmul.mubr.bf16.gmra.mrb[12].mxu1 %v1111_v31 }
 0x105   : > { %v984_v32 = vpop.f32.mrb[0].mxu0  ;;  %v1008_v33 = vpop.f32.mrb[0].mxu1 }
 0x106   : > { %v985_v34 = vpop.f32.mrb[1].mxu0  ;;  %v1009_v36 = vpop.f32.mrb[1].mxu1 }
 0x107   : > { %v986_v37 = vadd.f32 %v985_v34, %v984_v32  ;;  %v1010_v38 = vadd.f32 %v1009_v36, %v1008_v33  ;;  %v987_v39 = vpop.f32.mrb[2].mxu0  ;;  %v1011_v40 = vpop.f32.mrb[2].mxu1 }
 0x108   : > { %v988_v41 = vpop.f32.mrb[3].mxu0  ;;  %v1012_v42 = vpop.f32.mrb[3].mxu1 }
 0x109   : > { %v728_v43 = vadd.f32 %v986_v37, %v1223_v35  ;;  %v736_v44 = vadd.f32 %v1010_v38, %v1223_v35  ;;  %v989_v45 = vadd.f32 %v988_v41, %v987_v39  ;;  %v1013_v46 = vadd.f32 %v1012_v42, %v1011_v40 }
 0x10b   : > { %v744_v47 = vmax.f32 %v728_v43, 0.0  ;;  %v752_v48 = vmax.f32 %v736_v44, 0.0  ;;  %v729_v49 = vadd.f32 %v989_v45, %v1223_v35  ;;  %v737_v50 = vadd.f32 %v1013_v46, %v1223_v35 }
 0x10d   : > { %760 = vst [vmem:[%s1231_s27] sm:$0xff] %v744_v47  ;;  %768 = vst [vmem:[%s1231_s27 + $0x40] sm:$0xff] %v752_v48  ;;  %v745_v51 = vmax.f32 %v729_v49, 0.0  ;;  %v753_v52 = vmax.f32 %v737_v50, 0.0  ;;  %v990_v53 = vpop.f32.mrb[4].mxu0  ;;  %v1014_v54 = vpop.f32.mrb[4].mxu1 }
 0x10e   : > { %v991_v55 = vpop.f32.mrb[5].mxu0  ;;  %v1015_v56 = vpop.f32.mrb[5].mxu1 }
 0x10f   : > { %761 = vst [vmem:[%s1231_s27 + $0x8] sm:$0xff] %v745_v51  ;;  %769 = vst [vmem:[%s1231_s27 + $0x48] sm:$0xff] %v753_v52  ;;  %v992_v57 = vadd.f32 %v991_v55, %v990_v53  ;;  %v1016_v58 = vadd.f32 %v1015_v56, %v1014_v54  ;;  %v993_v59 = vpop.f32.mrb[6].mxu0  ;;  %v1017_v60 = vpop.f32.mrb[6].mxu1 }
 0x110   : > { %v994_v61 = vpop.f32.mrb[7].mxu0  ;;  %v1018_v62 = vpop.f32.mrb[7].mxu1 }
 0x111   : > { %v730_v63 = vadd.f32 %v992_v57, %v1223_v35  ;;  %v738_v0 = vadd.f32 %v1016_v58, %v1223_v35  ;;  %v995_v1 = vadd.f32 %v994_v61, %v993_v59  ;;  %v1019_v2 = vadd.f32 %v1018_v62, %v1017_v60 }
 0x113   : > { %v746_v3 = vmax.f32 %v730_v63, 0.0  ;;  %v754_v4 = vmax.f32 %v738_v0, 0.0  ;;  %v731_v5 = vadd.f32 %v995_v1, %v1223_v35  ;;  %v739_v6 = vadd.f32 %v1019_v2, %v1223_v35 }
 0x115   : > { %762 = vst [vmem:[%s1231_s27 + $0x10] sm:$0xff] %v746_v3  ;;  %770 = vst [vmem:[%s1231_s27 + $0x50] sm:$0xff] %v754_v4  ;;  %v747_v7 = vmax.f32 %v731_v5, 0.0  ;;  %v755_v8 = vmax.f32 %v739_v6, 0.0  ;;  %v996_v9 = vpop.f32.mrb[8].mxu0  ;;  %v1020_v10 = vpop.f32.mrb[8].mxu1 }
 0x116   : > { %v997_v11 = vpop.f32.mrb[9].mxu0  ;;  %v1021_v12 = vpop.f32.mrb[9].mxu1 }
 0x117   : > { %763 = vst [vmem:[%s1231_s27 + $0x18] sm:$0xff] %v747_v7  ;;  %771 = vst [vmem:[%s1231_s27 + $0x58] sm:$0xff] %v755_v8  ;;  %v998_v13 = vadd.f32 %v997_v11, %v996_v9  ;;  %v1022_v14 = vadd.f32 %v1021_v12, %v1020_v10  ;;  %v999_v15 = vpop.f32.mrb[10].mxu0  ;;  %v1023_v16 = vpop.f32.mrb[10].mxu1 }
 0x118   : > { %v1000_v17 = vpop.f32.mrb[11].mxu0  ;;  %v1024_v18 = vpop.f32.mrb[11].mxu1 }
 0x119   : > { %v732_v19 = vadd.f32 %v998_v13, %v1223_v35  ;;  %v740_v20 = vadd.f32 %v1022_v14, %v1223_v35  ;;  %v1001_v21 = vadd.f32 %v1000_v17, %v999_v15  ;;  %v1025_v22 = vadd.f32 %v1024_v18, %v1023_v16 }
 0x11b   : > { %v748_v23 = vmax.f32 %v732_v19, 0.0  ;;  %v756_v24 = vmax.f32 %v740_v20, 0.0  ;;  %v733_v25 = vadd.f32 %v1001_v21, %v1223_v35  ;;  %v741_v26 = vadd.f32 %v1025_v22, %v1223_v35 }
 0x11d   : > { %764 = vst [vmem:[%s1231_s27 + $0x20] sm:$0xff] %v748_v23  ;;  %772 = vst [vmem:[%s1231_s27 + $0x60] sm:$0xff] %v756_v24  ;;  %v749_v27 = vmax.f32 %v733_v25, 0.0  ;;  %v757_v28 = vmax.f32 %v741_v26, 0.0  ;;  %v1002_v29 = vpop.f32.mrb[12].mxu0  ;;  %v1026_v30 = vpop.f32.mrb[12].mxu1 }
 0x11e   : > { %v1003_v31 = vpop.f32.mrb[13].mxu0  ;;  %v1027_v32 = vpop.f32.mrb[13].mxu1 }
 0x11f   : > { %765 = vst [vmem:[%s1231_s27 + $0x28] sm:$0xff] %v749_v27  ;;  %773 = vst [vmem:[%s1231_s27 + $0x68] sm:$0xff] %v757_v28  ;;  %v1004_v33 = vadd.f32 %v1003_v31, %v1002_v29  ;;  %v1028_v34 = vadd.f32 %v1027_v32, %v1026_v30  ;;  %v1005_v36 = vpop.f32.mrb[14].mxu0  ;;  %v1029_v37 = vpop.f32.mrb[14].mxu1 }
 0x120   : > { %v1006_v38 = vpop.f32.mrb[15].mxu0  ;;  %v1030_v39 = vpop.f32.mrb[15].mxu1 }
 0x121   : > { %v734_v40 = vadd.f32 %v1004_v33, %v1223_v35  ;;  %v742_v41 = vadd.f32 %v1028_v34, %v1223_v35  ;;  %v1007_v42 = vadd.f32 %v1006_v38, %v1005_v36  ;;  %v1031_v43 = vadd.f32 %v1030_v39, %v1029_v37 }
 0x123   : > { %v750_v44 = vmax.f32 %v734_v40, 0.0  ;;  %v758_v45 = vmax.f32 %v742_v41, 0.0  ;;  %v735_v46 = vadd.f32 %v1007_v42, %v1223_v35  ;;  %v743_v47 = vadd.f32 %v1031_v43, %v1223_v35 }
 0x125   : > { %766 = vst [vmem:[%s1231_s27 + $0x30] sm:$0xff] %v750_v44  ;;  %774 = vst [vmem:[%s1231_s27 + $0x70] sm:$0xff] %v758_v45  ;;  %v751_v48 = vmax.f32 %v735_v46, 0.0  ;;  %v759_v49 = vmax.f32 %v743_v47, 0.0 }
 0x127   : > { %767 = vst [vmem:[%s1231_s27 + $0x38] sm:$0xff] %v751_v48  ;;  %775 = vst [vmem:[%s1231_s27 + $0x78] sm:$0xff] %v759_v49 }
 0x128 PF: > { %s13_s14 = sadd.s32 1, %s1134_s14   ;;  %s1276_s12 = smov %s1130_s13 }
 0x129   : > { %p10_p5 = scmp.ge.s32.totalorder %s13_s14, 6   ;;  %s1277_s13 = smov %s1279_s15 }
 0x12b   :  { %12 = sbr.rel (!%p10_p5) target bundleno = 2 (0x2), region = 76 }

// kernel: decoder_forward.7
= control target key start
LH: loop header
LB: loop body
LE: loop exit
PB: predicated region body
PF: predicated region fallthrough
CT: control target
= control target key end

     0   :  { %s2009_s12 = smov 0   ;;  %s2011_s13 = smov 0   ;;  %s2229_s0 = inlined_call_operand.vmem [shape: bf16[4,512,128], index: 0, kind: input, shape index: {}]   ;;  %s2230_s1 = inlined_call_operand.vmem [shape: bf16[4,128,128], index: 1, kind: input, shape index: {}]   ;;  %s2231_s2 = inlined_call_operand.vmem [shape: f32[1,128], index: 2, kind: input, shape index: {}]   ;;  %s2232_s3 = inlined_call_operand.vmem [shape: f32[4,512,128], index: 3, kind: output, shape index: {}]  }
   0x1   :  { %s2013_s14 = smov 0  }
   0x2 LB: > { %s39_s15 = sadd.s32 1, %s1983_s13  ;;  %p1584_p0 = scmp.ge.s32.totalorder %s1987_s14, 1  ;;  %s1987_s14 = sphi %s2013_s14, %s13_s14   ;;  %s1983_s13 = sphi %s2011_s13, %s2234_s13   ;;  %s1979_s12 = sphi %s2009_s12, %s2233_s12  }
   0x3   : > { %p41_p1 = scmp.ge.s32.totalorder %s39_s15, 4  ;;  %p209_p2 = scmp.lt.s32.totalorder %s1987_s14, 5 }
   0x5   : > { %s2236_s15 = smov (%p41_p1, %s39_s15), 0  ;;  %p210_p3 = pnand %p1584_p0, %p209_p2 }
   0x6   : > { %p263_p4 = scmp.lt.s32.totalorder (!%p210_p3), %s1979_s12, 3  ;;  %v2084_v40 = vld [vmem:[%s2231_s2] ss:$0 sm:$0xff] (!%p210_p3) }
   0x7   : > { %213 = sbr.rel (%p210_p3) target bundleno = 342 (0x156), region = 32 }
   0xe   : > { %s2238_s12 = smov (!%p263_p4, %s1979_s12), 3 }
   0xf   : > { %s1635_s16 = sshll.u32 %s2238_s12, 6  ;;  %s1634_s20 = sshll.u32 %s2238_s12, 8 }
  0x10   : > { %s2033_s19 = scalar_lea.vmem %s2230_s1, %s1635_s16  ;;  %s2042_s23 = scalar_lea.vmem %s2229_s0, %s1634_s20 }
  0x11   : > { %v1797_v0 = vld [vmem:[%s2033_s19] sm:$0xff]   ;;  %v1798_v1 = vld [vmem:[%s2033_s19 + $0x8] sm:$0xff]   ;;  %v1799_v2 = vld [vmem:[%s2033_s19 + $0x10] sm:$0xff]   ;;  %s1636_s26 = sshll.u32 %s2238_s12, 9 }
  0x12   : > { %1677 = vmatprep.subr.bf16.mxu0 %v1797_v0  ;;  %1757 = vmatprep.subr.bf16.mxu1 %v1797_v0  ;;  %v1800_v3 = vld [vmem:[%s2033_s19 + $0x18] sm:$0xff]   ;;  %v1805_v4 = vld [vmem:[%s2042_s23] sm:$0xff]   ;;  %v1802_v7 = vld [vmem:[%s2033_s19 + $0x28] sm:$0xff]   ;;  %s2102_s29 = scalar_lea.vmem %s2232_s3, %s1636_s26 }
  0x13   : > { %1678 = vmatpush3.bf16.msra.mxu0 %v1797_v0  ;;  %1765 = vmatpush3.bf16.msra.mxu1 %v1797_v0  ;;  %v1806_v5 = vld [vmem:[%s2042_s23 + $0x80] sm:$0xff]   ;;  %v1803_v8 = vld [vmem:[%s2033_s19 + $0x30] sm:$0xff]   ;;  %v1804_v9 = vld [vmem:[%s2033_s19 + $0x38] sm:$0xff]  }
  0x14   : > { %1679 = vmatprep.subr.bf16.mxu0 %v1798_v1  ;;  %1758 = vmatprep.subr.bf16.mxu1 %v1798_v1  ;;  %v1801_v6 = vld [vmem:[%s2033_s19 + $0x20] sm:$0xff]   ;;  %v1807_v10 = vld [vmem:[%s2042_s23 + $0x8] sm:$0xff]   ;;  %v1809_v12 = vld [vmem:[%s2042_s23 + $0x10] sm:$0xff]  }
  0x15   : > { %1693 = vmatprep.mubr.bf16.mxu0 %v1805_v4  ;;  %1725 = vmatprep.mubr.bf16.mxu1 %v1806_v5  ;;  %v1808_v11 = vld [vmem:[%s2042_s23 + $0x88] sm:$0xff]   ;;  %v1810_v13 = vld [vmem:[%s2042_s23 + $0x90] sm:$0xff]   ;;  %v1811_v14 = vld [vmem:[%s2042_s23 + $0x18] sm:$0xff]  }
  0x16   : > { %v1812_v15 = vld [vmem:[%s2042_s23 + $0x98] sm:$0xff]   ;;  %v1813_v16 = vld [vmem:[%s2042_s23 + $0x20] sm:$0xff]   ;;  %v1815_v18 = vld [vmem:[%s2042_s23 + $0x28] sm:$0xff]  }
  0x17   : > { %1680 = vmatpush3.bf16.msra.mxu0 %v1798_v1  ;;  %1766 = vmatpush3.bf16.msra.mxu1 %v1798_v1  ;;  %v1814_v17 = vld [vmem:[%s2042_s23 + $0xa0] sm:$0xff]   ;;  %v1816_v19 = vld [vmem:[%s2042_s23 + $0xa8] sm:$0xff]   ;;  %v1817_v20 = vld [vmem:[%s2042_s23 + $0x30] sm:$0xff]  }
  0x18   : > { %1681 = vmatprep.subr.bf16.mxu0 %v1799_v2  ;;  %1759 = vmatprep.subr.bf16.mxu1 %v1799_v2  ;;  %v1818_v21 = vld [vmem:[%s2042_s23 + $0xb0] sm:$0xff]   ;;  %v1819_v22 = vld [vmem:[%s2042_s23 + $0x38] sm:$0xff]   ;;  %v1821_v24 = vld [vmem:[%s2042_s23 + $0x40] sm:$0xff]  }
  0x19   : > { %v1820_v23 = vld [vmem:[%s2042_s23 + $0xb8] sm:$0xff]   ;;  %v1822_v25 = vld [vmem:[%s2042_s23 + $0xc0] sm:$0xff]   ;;  %v1823_v26 = vld [vmem:[%s2042_s23 + $0x48] sm:$0xff]  }
  0x1a   : > { %v1824_v27 = vld [vmem:[%s2042_s23 + $0xc8] sm:$0xff]   ;;  %v1825_v28 = vld [vmem:[%s2042_s23 + $0x50] sm:$0xff]   ;;  %v1827_v30 = vld [vmem:[%s2042_s23 + $0x58] sm:$0xff]  }
  0x1b   : > { %1682 = vmatpush3.bf16.msra.mxu0 %v1799_v2  ;;  %1767 = vmatpush3.bf16.msra.mxu1 %v1799_v2  ;;  %v1826_v29 = vld [vmem:[%s2042_s23 + $0xd0] sm:$0xff]   ;;  %v1828_v31 = vld [vmem:[%s2042_s23 + $0xd8] sm:$0xff]   ;;  %v1829_v32 = vld [vmem:[%s2042_s23 + $0x60] sm:$0xff]  }
  0x1c   : > { %1683 = vmatprep.subr.bf16.mxu0 %v1800_v3  ;;  %1760 = vmatprep.subr.bf16.mxu1 %v1800_v3  ;;  %v1830_v33 = vld [vmem:[%s2042_s23 + $0xe0] sm:$0xff]   ;;  %v1831_v34 = vld [vmem:[%s2042_s23 + $0x68] sm:$0xff]   ;;  %v1833_v36 = vld [vmem:[%s2042_s23 + $0x70] sm:$0xff]  }
  0x1d   : > { %v1832_v35 = vld [vmem:[%s2042_s23 + $0xe8] sm:$0xff]   ;;  %v1834_v37 = vld [vmem:[%s2042_s23 + $0xf0] sm:$0xff]   ;;  %v1835_v38 = vld [vmem:[%s2042_s23 + $0x78] sm:$0xff]  }
  0x1e   : > { %v1836_v39 = vld [vmem:[%s2042_s23 + $0xf8] sm:$0xff]  }
  0x1f   : > { %1684 = vmatpush3.bf16.msra.mxu0 %v1800_v3  ;;  %1768 = vmatpush3.bf16.msra.mxu1 %v1800_v3 }
  0x20   : > { %1685 = vmatprep.subr.bf16.mxu0 %v1801_v6  ;;  %1761 = vmatprep.subr.bf16.mxu1 %v1801_v6 }
  0x23   : > { %1686 = vmatpush3.bf16.msra.mxu0 %v1801_v6  ;;  %1769 = vmatpush3.bf16.msra.mxu1 %v1801_v6 }
  0x24   : > { %1687 = vmatprep.subr.bf16.mxu0 %v1802_v7  ;;  %1762 = vmatprep.subr.bf16.mxu1 %v1802_v7 }
  0x27   : > { %1688 = vmatpush3.bf16.msra.mxu0 %v1802_v7  ;;  %1770 = vmatpush3.bf16.msra.mxu1 %v1802_v7 }
  0x28   : > { %1689 = vmatprep.subr.bf16.mxu0 %v1803_v8  ;;  %1763 = vmatprep.subr.bf16.mxu1 %v1803_v8 }
  0x2b   : > { %1690 = vmatpush3.bf16.msra.mxu0 %v1803_v8  ;;  %1771 = vmatpush3.bf16.msra.mxu1 %v1803_v8 }
  0x2c   : > { %1691 = vmatprep.subr.bf16.mxu0 %v1804_v9  ;;  %1764 = vmatprep.subr.bf16.mxu1 %v1804_v9 }
  0x2f   : > { %1692 = vmatpush3.bf16.msra.mxu0 %v1804_v9  ;;  %1772 = vmatpush3.bf16.msra.mxu1 %v1804_v9 }
  0x32   : > { %1694 = vmatmul.mubr.bf16.vlgmr.msra.gmra.mrb[0].mxu0 %v1807_v10  ;;  %1726 = vmatmul.mubr.bf16.vlgmr.msra.gmra.mrb[0].mxu1 %v1808_v11 }
  0x33   : > { %1697 = vmatprep.mubr.bf16.mxu0 %v1809_v12  ;;  %1729 = vmatprep.mubr.bf16.mxu1 %v1810_v13 }
  0x3a   : > { %1698 = vmatmul.mubr.bf16.gmra.mrb[4].mxu0 %v1811_v14  ;;  %1730 = vmatmul.mubr.bf16.gmra.mrb[4].mxu1 %v1812_v15 }
  0x3b   : > { %1701 = vmatprep.mubr.bf16.mxu0 %v1813_v16  ;;  %1733 = vmatprep.mubr.bf16.mxu1 %v1814_v17 }
  0x42   : > { %1702 = vmatmul.mubr.bf16.gmra.mrb[8].mxu0 %v1815_v18  ;;  %1734 = vmatmul.mubr.bf16.gmra.mrb[8].mxu1 %v1816_v19 }
  0x43   : > { %1705 = vmatprep.mubr.bf16.mxu0 %v1817_v20  ;;  %1737 = vmatprep.mubr.bf16.mxu1 %v1818_v21 }
  0x4a   : > { %1706 = vmatmul.mubr.bf16.gmra.mrb[12].mxu0 %v1819_v22  ;;  %1738 = vmatmul.mubr.bf16.gmra.mrb[12].mxu1 %v1820_v23 }
  0x4b   : > { %1709 = vmatprep.mubr.bf16.mxu0 %v1821_v24  ;;  %1741 = vmatprep.mubr.bf16.mxu1 %v1822_v25 }
  0x52   : > { %1710 = vmatmul.mubr.bf16.gmra.mrb[16].mxu0 %v1823_v26  ;;  %1742 = vmatmul.mubr.bf16.gmra.mrb[16].mxu1 %v1824_v27 }
  0x53   : > { %1713 = vmatprep.mubr.bf16.mxu0 %v1825_v28  ;;  %1745 = vmatprep.mubr.bf16.mxu1 %v1826_v29 }
  0x5a   : > { %1714 = vmatmul.mubr.bf16.gmra.mrb[20].mxu0 %v1827_v30  ;;  %1746 = vmatmul.mubr.bf16.gmra.mrb[20].mxu1 %v1828_v31 }
  0x5b   : > { %1717 = vmatprep.mubr.bf16.mxu0 %v1829_v32  ;;  %1749 = vmatprep.mubr.bf16.mxu1 %v1830_v33 }
  0x62   : > { %1718 = vmatmul.mubr.bf16.gmra.mrb[24].mxu0 %v1831_v34  ;;  %1750 = vmatmul.mubr.bf16.gmra.mrb[24].mxu1 %v1832_v35 }
  0x63   : > { %1721 = vmatprep.mubr.bf16.mxu0 %v1833_v36  ;;  %1753 = vmatprep.mubr.bf16.mxu1 %v1834_v37 }
  0x6a   : > { %1722 = vmatmul.mubr.bf16.gmra.mrb[28].mxu0 %v1835_v38  ;;  %1754 = vmatmul.mubr.bf16.gmra.mrb[28].mxu1 %v1836_v39 }
 0x105   : > { %v1695_v41 = vpop.f32.mrb[0].mxu0  ;;  %v1727_v42 = vpop.f32.mrb[0].mxu1 }
 0x106   : > { %v1250_v43 = vadd.f32 %v1695_v41, %v2084_v40  ;;  %v1282_v44 = vadd.f32 %v1727_v42, %v2084_v40  ;;  %v791_v45 = vpop.f32.mrb[1].mxu0  ;;  %v919_v46 = vpop.f32.mrb[1].mxu1 }
 0x107   : > { %v1248_v47 = vadd.f32 %v2084_v40, %v791_v45  ;;  %v1280_v48 = vadd.f32 %v2084_v40, %v919_v46  ;;  %v1696_v49 = vpop.f32.mrb[2].mxu0  ;;  %v1728_v50 = vpop.f32.mrb[2].mxu1 }
 0x108   : > { %1837 = vtanh.f32 %v1250_v43  ;;  %v1251_v51 = vadd.f32 %v1696_v49, %v2084_v40  ;;  %v794_v52 = vpop.f32.mrb[3].mxu0  ;;  %v922_v53 = vpop.f32.mrb[3].mxu1  ;;  %v1283_v54 = vadd.f32 %v1728_v50, %v2084_v40 }
 0x109   : > { %1839 = vtanh.f32 %v1282_v44  ;;  %v1249_v55 = vadd.f32 %v2084_v40, %v794_v52  ;;  %v1281_v56 = vadd.f32 %v2084_v40, %v922_v53 }
 0x10a   : > { %1841 = vtanh.f32 %v1248_v47 }
 0x10b   : > { %1843 = vtanh.f32 %v1280_v48 }
 0x10c   : > { %1845 = vtanh.f32 %v1251_v51 }
 0x10d   : > { %1847 = vtanh.f32 %v1283_v54  ;;  %v1699_v57 = vpop.f32.mrb[4].mxu0  ;;  %v1731_v58 = vpop.f32.mrb[4].mxu1 }
 0x10e   : > { %1849 = vtanh.f32 %v1249_v55  ;;  %v1254_v59 = vadd.f32 %v1699_v57, %v2084_v40  ;;  %v1286_v60 = vadd.f32 %v1731_v58, %v2084_v40  ;;  %v807_v61 = vpop.f32.mrb[5].mxu0  ;;  %v935_v62 = vpop.f32.mrb[5].mxu1 }
 0x10f   : > { %1851 = vtanh.f32 %v1281_v56  ;;  %v1252_v63 = vadd.f32 %v2084_v40, %v807_v61  ;;  %v1284_v0 = vadd.f32 %v2084_v40, %v935_v62  ;;  %v1700_v1 = vpop.f32.mrb[6].mxu0  ;;  %v1732_v2 = vpop.f32.mrb[6].mxu1 }
 0x110   : > { %1853 = vtanh.f32 %v1254_v59  ;;  %v1255_v3 = vadd.f32 %v1700_v1, %v2084_v40  ;;  %v810_v4 = vpop.f32.mrb[7].mxu0  ;;  %v938_v5 = vpop.f32.mrb[7].mxu1  ;;  %v1287_v6 = vadd.f32 %v1732_v2, %v2084_v40 }
 0x111   : > { %1855 = vtanh.f32 %v1286_v60  ;;  %v1253_v8 = vadd.f32 %v2084_v40, %v810_v4  ;;  %v1285_v10 = vadd.f32 %v2084_v40, %v938_v5 }
 0x112   : > { %v1838_v7 = vpop.eup %1837  ;;  %1857 = vtanh.f32 %v1252_v63 }
 0x113   : > { %v1840_v9 = vpop.eup %1839  ;;  %1378 = vst [vmem:[%s2102_s29 + $0x10] sm:$0xff] %v1838_v7  ;;  %1859 = vtanh.f32 %v1284_v0 }
 0x114   : > { %v1842_v11 = vpop.eup %1841  ;;  %1410 = vst [vmem:[%s2102_s29 + $0x110] sm:$0xff] %v1840_v9  ;;  %1861 = vtanh.f32 %v1255_v3 }
 0x115   : > { %v1844_v12 = vpop.eup %1843  ;;  %1376 = vst [vmem:[%s2102_s29] sm:$0xff] %v1842_v11  ;;  %1863 = vtanh.f32 %v1287_v6  ;;  %v1703_v13 = vpop.f32.mrb[8].mxu0 }
 0x116   : > { %v1735_v14 = vpop.f32.mrb[8].mxu1  ;;  %v1846_v15 = vpop.eup %1845  ;;  %1408 = vst [vmem:[%s2102_s29 + $0x100] sm:$0xff] %v1844_v12  ;;  %1865 = vtanh.f32 %v1253_v8  ;;  %v1258_v16 = vadd.f32 %v1703_v13, %v2084_v40 }
 0x117   : > { %v1290_v17 = vadd.f32 %v1735_v14, %v2084_v40  ;;  %v823_v18 = vpop.f32.mrb[9].mxu0  ;;  %v951_v19 = vpop.f32.mrb[9].mxu1  ;;  %1379 = vst [vmem:[%s2102_s29 + $0x18] sm:$0xff] %v1846_v15  ;;  %1867 = vtanh.f32 %v1285_v10 }
 0x118   : > { %v1848_v20 = vpop.eup %1847  ;;  %v1256_v21 = vadd.f32 %v2084_v40, %v823_v18  ;;  %v1288_v22 = vadd.f32 %v2084_v40, %v951_v19  ;;  %v1704_v23 = vpop.f32.mrb[10].mxu0  ;;  %1869 = vtanh.f32 %v1258_v16 }
 0x119   : > { %v1736_v24 = vpop.f32.mrb[10].mxu1  ;;  %v1850_v25 = vpop.eup %1849  ;;  %1411 = vst [vmem:[%s2102_s29 + $0x118] sm:$0xff] %v1848_v20  ;;  %v1259_v26 = vadd.f32 %v1704_v23, %v2084_v40  ;;  %1871 = vtanh.f32 %v1290_v17 }
 0x11a   : > { %v826_v27 = vpop.f32.mrb[11].mxu0  ;;  %v954_v28 = vpop.f32.mrb[11].mxu1  ;;  %1377 = vst [vmem:[%s2102_s29 + $0x8] sm:$0xff] %v1850_v25  ;;  %v1291_v30 = vadd.f32 %v1736_v24, %v2084_v40  ;;  %1873 = vtanh.f32 %v1256_v21 }
 0x11b   : > { %v1852_v29 = vpop.eup %1851  ;;  %v1257_v32 = vadd.f32 %v2084_v40, %v826_v27  ;;  %1875 = vtanh.f32 %v1288_v22  ;;  %v1289_v34 = vadd.f32 %v2084_v40, %v954_v28 }
 0x11c   : > { %v1854_v31 = vpop.eup %1853  ;;  %1409 = vst [vmem:[%s2102_s29 + $0x108] sm:$0xff] %v1852_v29  ;;  %1877 = vtanh.f32 %v1259_v26 }
 0x11d   : > { %v1856_v33 = vpop.eup %1855  ;;  %1382 = vst [vmem:[%s2102_s29 + $0x30] sm:$0xff] %v1854_v31  ;;  %1879 = vtanh.f32 %v1291_v30  ;;  %v1707_v37 = vpop.f32.mrb[12].mxu0 }
 0x11e   : > { %v1858_v35 = vpop.eup %1857  ;;  %1414 = vst [vmem:[%s2102_s29 + $0x130] sm:$0xff] %v1856_v33  ;;  %v1739_v38 = vpop.f32.mrb[12].mxu1  ;;  %1881 = vtanh.f32 %v1257_v32  ;;  %v1262_v41 = vadd.f32 %v1707_v37, %v2084_v40 }
 0x11f   : > { %v1860_v36 = vpop.eup %1859  ;;  %1380 = vst [vmem:[%s2102_s29 + $0x20] sm:$0xff] %v1858_v35  ;;  %v1294_v42 = vadd.f32 %v1739_v38, %v2084_v40  ;;  %v839_v43 = vpop.f32.mrb[13].mxu0  ;;  %1883 = vtanh.f32 %v1289_v34 }
 0x120   : > { %v1862_v39 = vpop.eup %1861  ;;  %1412 = vst [vmem:[%s2102_s29 + $0x120] sm:$0xff] %v1860_v36  ;;  %v967_v44 = vpop.f32.mrb[13].mxu1  ;;  %v1260_v46 = vadd.f32 %v2084_v40, %v839_v43  ;;  %1885 = vtanh.f32 %v1262_v41 }
 0x121   : > { %v1864_v45 = vpop.eup %1863  ;;  %1383 = vst [vmem:[%s2102_s29 + $0x38] sm:$0xff] %v1862_v39  ;;  %v1292_v47 = vadd.f32 %v2084_v40, %v967_v44  ;;  %v1708_v48 = vpop.f32.mrb[14].mxu0  ;;  %1887 = vtanh.f32 %v1294_v42 }
 0x122   : > { %v1740_v49 = vpop.f32.mrb[14].mxu1  ;;  %v1866_v50 = vpop.eup %1865  ;;  %1415 = vst [vmem:[%s2102_s29 + $0x138] sm:$0xff] %v1864_v45  ;;  %v1263_v51 = vadd.f32 %v1708_v48, %v2084_v40  ;;  %1889 = vtanh.f32 %v1260_v46 }
 0x123   : > { %v842_v52 = vpop.f32.mrb[15].mxu0  ;;  %v970_v53 = vpop.f32.mrb[15].mxu1  ;;  %1381 = vst [vmem:[%s2102_s29 + $0x28] sm:$0xff] %v1866_v50  ;;  %v1295_v55 = vadd.f32 %v1740_v49, %v2084_v40  ;;  %1891 = vtanh.f32 %v1292_v47 }
 0x124   : > { %v1868_v54 = vpop.eup %1867  ;;  %v1261_v57 = vadd.f32 %v2084_v40, %v842_v52  ;;  %v1293_v59 = vadd.f32 %v2084_v40, %v970_v53  ;;  %1893 = vtanh.f32 %v1263_v51 }
 0x125   : > { %v1870_v56 = vpop.eup %1869  ;;  %1413 = vst [vmem:[%s2102_s29 + $0x128] sm:$0xff] %v1868_v54  ;;  %1895 = vtanh.f32 %v1295_v55  ;;  %v1711_v62 = vpop.f32.mrb[16].mxu0 }
 0x126   : > { %v1872_v58 = vpop.eup %1871  ;;  %1386 = vst [vmem:[%s2102_s29 + $0x50] sm:$0xff] %v1870_v56  ;;  %v1743_v63 = vpop.f32.mrb[16].mxu1  ;;  %1897 = vtanh.f32 %v1261_v57  ;;  %v1266_v1 = vadd.f32 %v1711_v62, %v2084_v40 }
 0x127   : > { %v1874_v60 = vpop.eup %1873  ;;  %1418 = vst [vmem:[%s2102_s29 + $0x150] sm:$0xff] %v1872_v58  ;;  %v1298_v2 = vadd.f32 %v1743_v63, %v2084_v40  ;;  %v855_v3 = vpop.f32.mrb[17].mxu0  ;;  %1899 = vtanh.f32 %v1293_v59 }
 0x128   : > { %v1876_v61 = vpop.eup %1875  ;;  %1384 = vst [vmem:[%s2102_s29 + $0x40] sm:$0xff] %v1874_v60  ;;  %v983_v4 = vpop.f32.mrb[17].mxu1  ;;  %v1264_v6 = vadd.f32 %v2084_v40, %v855_v3  ;;  %1901 = vtanh.f32 %v1266_v1 }
 0x129   : > { %v1878_v0 = vpop.eup %1877  ;;  %1416 = vst [vmem:[%s2102_s29 + $0x140] sm:$0xff] %v1876_v61  ;;  %v1296_v7 = vadd.f32 %v2084_v40, %v983_v4  ;;  %v1712_v8 = vpop.f32.mrb[18].mxu0  ;;  %1903 = vtanh.f32 %v1298_v2 }
 0x12a   : > { %v1880_v5 = vpop.eup %1879  ;;  %1387 = vst [vmem:[%s2102_s29 + $0x58] sm:$0xff] %v1878_v0  ;;  %v1744_v9 = vpop.f32.mrb[18].mxu1  ;;  %v1267_v11 = vadd.f32 %v1712_v8, %v2084_v40  ;;  %1905 = vtanh.f32 %v1264_v6 }
 0x12b   : > { %v1882_v10 = vpop.eup %1881  ;;  %1419 = vst [vmem:[%s2102_s29 + $0x158] sm:$0xff] %v1880_v5  ;;  %v858_v12 = vpop.f32.mrb[19].mxu0  ;;  %v1299_v15 = vadd.f32 %v1744_v9, %v2084_v40  ;;  %1907 = vtanh.f32 %v1296_v7 }
 0x12c   : > { %v986_v13 = vpop.f32.mrb[19].mxu1  ;;  %v1884_v14 = vpop.eup %1883  ;;  %1385 = vst [vmem:[%s2102_s29 + $0x48] sm:$0xff] %v1882_v10  ;;  %v1265_v17 = vadd.f32 %v2084_v40, %v858_v12  ;;  %1909 = vtanh.f32 %v1267_v11 }
 0x12d   : > { %v1886_v16 = vpop.eup %1885  ;;  %1417 = vst [vmem:[%s2102_s29 + $0x148] sm:$0xff] %v1884_v14  ;;  %v1297_v19 = vadd.f32 %v2084_v40, %v986_v13  ;;  %1911 = vtanh.f32 %v1299_v15  ;;  %v1715_v22 = vpop.f32.mrb[20].mxu0 }
 0x12e   : > { %v1888_v18 = vpop.eup %1887  ;;  %1390 = vst [vmem:[%s2102_s29 + $0x70] sm:$0xff] %v1886_v16  ;;  %v1747_v23 = vpop.f32.mrb[20].mxu1  ;;  %1913 = vtanh.f32 %v1265_v17  ;;  %v1270_v25 = vadd.f32 %v1715_v22, %v2084_v40 }
 0x12f   : > { %v1890_v20 = vpop.eup %1889  ;;  %1422 = vst [vmem:[%s2102_s29 + $0x170] sm:$0xff] %v1888_v18  ;;  %v1302_v26 = vadd.f32 %v1747_v23, %v2084_v40  ;;  %v871_v27 = vpop.f32.mrb[21].mxu0  ;;  %1915 = vtanh.f32 %v1297_v19 }
 0x130   : > { %v1892_v21 = vpop.eup %1891  ;;  %1388 = vst [vmem:[%s2102_s29 + $0x60] sm:$0xff] %v1890_v20  ;;  %v999_v28 = vpop.f32.mrb[21].mxu1  ;;  %v1268_v30 = vadd.f32 %v2084_v40, %v871_v27  ;;  %1917 = vtanh.f32 %v1270_v25 }
 0x131   : > { %v1894_v24 = vpop.eup %1893  ;;  %1420 = vst [vmem:[%s2102_s29 + $0x160] sm:$0xff] %v1892_v21  ;;  %v1300_v31 = vadd.f32 %v2084_v40, %v999_v28  ;;  %v1716_v32 = vpop.f32.mrb[22].mxu0  ;;  %1919 = vtanh.f32 %v1302_v26 }
 0x132   : > { %v1896_v29 = vpop.eup %1895  ;;  %1391 = vst [vmem:[%s2102_s29 + $0x78] sm:$0xff] %v1894_v24  ;;  %v1748_v33 = vpop.f32.mrb[22].mxu1  ;;  %v1271_v35 = vadd.f32 %v1716_v32, %v2084_v40  ;;  %1921 = vtanh.f32 %v1268_v30 }
 0x133   : > { %v1898_v34 = vpop.eup %1897  ;;  %1423 = vst [vmem:[%s2102_s29 + $0x178] sm:$0xff] %v1896_v29  ;;  %v874_v36 = vpop.f32.mrb[23].mxu0  ;;  %v1303_v39 = vadd.f32 %v1748_v33, %v2084_v40  ;;  %1923 = vtanh.f32 %v1300_v31 }
 0x134   : > { %v1002_v37 = vpop.f32.mrb[23].mxu1  ;;  %v1900_v38 = vpop.eup %1899  ;;  %1389 = vst [vmem:[%s2102_s29 + $0x68] sm:$0xff] %v1898_v34  ;;  %v1269_v42 = vadd.f32 %v2084_v40, %v874_v36  ;;  %1925 = vtanh.f32 %v1271_v35 }
 0x135   : > { %v1902_v41 = vpop.eup %1901  ;;  %1421 = vst [vmem:[%s2102_s29 + $0x168] sm:$0xff] %v1900_v38  ;;  %v1301_v44 = vadd.f32 %v2084_v40, %v1002_v37  ;;  %1927 = vtanh.f32 %v1303_v39  ;;  %v1719_v47 = vpop.f32.mrb[24].mxu0 }
 0x136   : > { %v1904_v43 = vpop.eup %1903  ;;  %1394 = vst [vmem:[%s2102_s29 + $0x90] sm:$0xff] %v1902_v41  ;;  %v1751_v48 = vpop.f32.mrb[24].mxu1  ;;  %1929 = vtanh.f32 %v1269_v42  ;;  %v1274_v50 = vadd.f32 %v1719_v47, %v2084_v40 }
 0x137   : > { %v1906_v45 = vpop.eup %1905  ;;  %1426 = vst [vmem:[%s2102_s29 + $0x190] sm:$0xff] %v1904_v43  ;;  %v1306_v51 = vadd.f32 %v1751_v48, %v2084_v40  ;;  %v887_v52 = vpop.f32.mrb[25].mxu0  ;;  %1931 = vtanh.f32 %v1301_v44 }
 0x138   : > { %v1908_v46 = vpop.eup %1907  ;;  %1392 = vst [vmem:[%s2102_s29 + $0x80] sm:$0xff] %v1906_v45  ;;  %v1015_v53 = vpop.f32.mrb[25].mxu1  ;;  %v1272_v55 = vadd.f32 %v2084_v40, %v887_v52  ;;  %1933 = vtanh.f32 %v1274_v50 }
 0x139   : > { %v1910_v49 = vpop.eup %1909  ;;  %1424 = vst [vmem:[%s2102_s29 + $0x180] sm:$0xff] %v1908_v46  ;;  %v1304_v56 = vadd.f32 %v2084_v40, %v1015_v53  ;;  %v1720_v57 = vpop.f32.mrb[26].mxu0  ;;  %1935 = vtanh.f32 %v1306_v51 }
 0x13a   : > { %v1912_v54 = vpop.eup %1911  ;;  %1395 = vst [vmem:[%s2102_s29 + $0x98] sm:$0xff] %v1910_v49  ;;  %v1752_v58 = vpop.f32.mrb[26].mxu1  ;;  %v1275_v60 = vadd.f32 %v1720_v57, %v2084_v40  ;;  %1937 = vtanh.f32 %v1272_v55 }
 0x13b   : > { %v1914_v59 = vpop.eup %1913  ;;  %1427 = vst [vmem:[%s2102_s29 + $0x198] sm:$0xff] %v1912_v54  ;;  %v890_v61 = vpop.f32.mrb[27].mxu0  ;;  %v1307_v0 = vadd.f32 %v1752_v58, %v2084_v40  ;;  %1939 = vtanh.f32 %v1304_v56 }
 0x13c   : > { %v1018_v62 = vpop.f32.mrb[27].mxu1  ;;  %v1916_v63 = vpop.eup %1915  ;;  %1393 = vst [vmem:[%s2102_s29 + $0x88] sm:$0xff] %v1914_v59  ;;  %v1273_v2 = vadd.f32 %v2084_v40, %v890_v61  ;;  %1941 = vtanh.f32 %v1275_v60 }
 0x13d   : > { %v1918_v1 = vpop.eup %1917  ;;  %1425 = vst [vmem:[%s2102_s29 + $0x188] sm:$0xff] %v1916_v63  ;;  %v1305_v4 = vadd.f32 %v2084_v40, %v1018_v62  ;;  %1943 = vtanh.f32 %v1307_v0  ;;  %v1723_v7 = vpop.f32.mrb[28].mxu0 }
 0x13e   : > { %v1920_v3 = vpop.eup %1919  ;;  %1398 = vst [vmem:[%s2102_s29 + $0xb0] sm:$0xff] %v1918_v1  ;;  %v1755_v8 = vpop.f32.mrb[28].mxu1  ;;  %1945 = vtanh.f32 %v1273_v2  ;;  %v1278_v10 = vadd.f32 %v1723_v7, %v2084_v40 }
 0x13f   : > { %v1922_v5 = vpop.eup %1921  ;;  %1430 = vst [vmem:[%s2102_s29 + $0x1b0] sm:$0xff] %v1920_v3  ;;  %v1310_v11 = vadd.f32 %v1755_v8, %v2084_v40  ;;  %v903_v12 = vpop.f32.mrb[29].mxu0  ;;  %1947 = vtanh.f32 %v1305_v4 }
 0x140   : > { %v1924_v6 = vpop.eup %1923  ;;  %1396 = vst [vmem:[%s2102_s29 + $0xa0] sm:$0xff] %v1922_v5  ;;  %v1031_v13 = vpop.f32.mrb[29].mxu1  ;;  %v1276_v15 = vadd.f32 %v2084_v40, %v903_v12  ;;  %1949 = vtanh.f32 %v1278_v10 }
 0x141   : > { %v1926_v9 = vpop.eup %1925  ;;  %1428 = vst [vmem:[%s2102_s29 + $0x1a0] sm:$0xff] %v1924_v6  ;;  %v1308_v16 = vadd.f32 %v2084_v40, %v1031_v13  ;;  %v1724_v17 = vpop.f32.mrb[30].mxu0  ;;  %1951 = vtanh.f32 %v1310_v11 }
 0x142   : > { %v1928_v14 = vpop.eup %1927  ;;  %1399 = vst [vmem:[%s2102_s29 + $0xb8] sm:$0xff] %v1926_v9  ;;  %v1756_v18 = vpop.f32.mrb[30].mxu1  ;;  %v1279_v20 = vadd.f32 %v1724_v17, %v2084_v40  ;;  %1953 = vtanh.f32 %v1276_v15 }
 0x143   : > { %v1930_v19 = vpop.eup %1929  ;;  %1431 = vst [vmem:[%s2102_s29 + $0x1b8] sm:$0xff] %v1928_v14  ;;  %v906_v21 = vpop.f32.mrb[31].mxu0  ;;  %v1311_v24 = vadd.f32 %v1756_v18, %v2084_v40  ;;  %1955 = vtanh.f32 %v1308_v16 }
 0x144   : > { %v1034_v22 = vpop.f32.mrb[31].mxu1  ;;  %v1932_v23 = vpop.eup %1931  ;;  %1397 = vst [vmem:[%s2102_s29 + $0xa8] sm:$0xff] %v1930_v19  ;;  %v1277_v26 = vadd.f32 %v2084_v40, %v906_v21  ;;  %1957 = vtanh.f32 %v1279_v20 }
 0x145   : > { %v1934_v25 = vpop.eup %1933  ;;  %1429 = vst [vmem:[%s2102_s29 + $0x1a8] sm:$0xff] %v1932_v23  ;;  %v1309_v28 = vadd.f32 %v2084_v40, %v1034_v22  ;;  %1959 = vtanh.f32 %v1311_v24 }
 0x146   : > { %v1936_v27 = vpop.eup %1935  ;;  %1402 = vst [vmem:[%s2102_s29 + $0xd0] sm:$0xff] %v1934_v25  ;;  %1961 = vtanh.f32 %v1277_v26 }
 0x147   : > { %v1938_v29 = vpop.eup %1937  ;;  %1434 = vst [vmem:[%s2102_s29 + $0x1d0] sm:$0xff] %v1936_v27  ;;  %1963 = vtanh.f32 %v1309_v28 }
 0x148   : > { %v1940_v30 = vpop.eup %1939  ;;  %1400 = vst [vmem:[%s2102_s29 + $0xc0] sm:$0xff] %v1938_v29 }
 0x149   : > { %v1942_v31 = vpop.eup %1941  ;;  %1432 = vst [vmem:[%s2102_s29 + $0x1c0] sm:$0xff] %v1940_v30 }
 0x14a   : > { %v1944_v32 = vpop.eup %1943  ;;  %1403 = vst [vmem:[%s2102_s29 + $0xd8] sm:$0xff] %v1942_v31 }
 0x14b   : > { %v1946_v40 = vpop.eup %1945  ;;  %1435 = vst [vmem:[%s2102_s29 + $0x1d8] sm:$0xff] %v1944_v32 }
 0x14c   : > { %v1948_v33 = vpop.eup %1947  ;;  %1401 = vst [vmem:[%s2102_s29 + $0xc8] sm:$0xff] %v1946_v40 }
 0x14d   : > { %v1950_v34 = vpop.eup %1949  ;;  %1433 = vst [vmem:[%s2102_s29 + $0x1c8] sm:$0xff] %v1948_v33 }
 0x14e   : > { %v1952_v35 = vpop.eup %1951  ;;  %1406 = vst [vmem:[%s2102_s29 + $0xf0] sm:$0xff] %v1950_v34 }
 0x14f   : > { %v1954_v36 = vpop.eup %1953  ;;  %1438 = vst [vmem:[%s2102_s29 + $0x1f0] sm:$0xff] %v1952_v35 }
 0x150   : > { %v1956_v37 = vpop.eup %1955  ;;  %1404 = vst [vmem:[%s2102_s29 + $0xe0] sm:$0xff] %v1954_v36 }
 0x151   : > { %v1958_v38 = vpop.eup %1957  ;;  %1436 = vst [vmem:[%s2102_s29 + $0x1e0] sm:$0xff] %v1956_v37 }
 0x152   : > { %v1960_v39 = vpop.eup %1959  ;;  %1407 = vst [vmem:[%s2102_s29 + $0xf8] sm:$0xff] %v1958_v38 }
 0x153   : > { %v1962_v41 = vpop.eup %1961  ;;  %1439 = vst [vmem:[%s2102_s29 + $0x1f8] sm:$0xff] %v1960_v39 }
 0x154   : > { %v1964_v42 = vpop.eup %1963  ;;  %1405 = vst [vmem:[%s2102_s29 + $0xe8] sm:$0xff] %v1962_v41 }
 0x155   : > { %1437 = vst [vmem:[%s2102_s29 + $0x1e8] sm:$0xff] %v1964_v42 }
 0x156 PF: > { %s13_s14 = sadd.s32 1, %s1987_s14   ;;  %s2233_s12 = smov %s1983_s13 }
 0x157   : > { %p10_p5 = scmp.ge.s32.totalorder %s13_s14, 6   ;;  %s2234_s13 = smov %s2236_s15 }
 0x159   :  { %12 = sbr.rel (!%p10_p5) target bundleno = 2 (0x2), region = 76 }

</bundles_post_ra>
